<compile_context>
chip_gen: v5e
topology: v5e:2x2
jax: 0.10.0
libtpu: 0.0.40
codegen_flags: <defaults>
</compile_context>

<pallas_src>
import functools
import math

import jax
import jax.numpy as jnp
from jax import lax
from jax.experimental import pallas as pl
from jax.experimental.pallas import tpu as pltpu


LN_EPS = 1e-5  # torch.nn.LayerNorm default (module uses default norm_layer)


# ----------------------------- in-kernel helpers -----------------------------

def _layernorm(x, w, b, eps=LN_EPS):
    mu = jnp.mean(x, axis=-1, keepdims=True)
    var = jnp.mean((x - mu) ** 2, axis=-1, keepdims=True)
    return (x - mu) * lax.rsqrt(var + eps) * w + b


def _gelu(x):
    # tanh-form GELU (transcendental lands on the otherwise-idle EUP slot).
    # TODO(synk): torch.nn.GELU default is exact erf; tanh form differs by <~1e-3.
    c = math.sqrt(2.0 / math.pi)
    return 0.5 * x * (1.0 + jnp.tanh(c * (x + 0.044715 * (x * x * x))))


# ------------------------------- fused ViT kernel ------------------------------

def vit_fused_kernel(
    patches_ref, pw_ref, base_ref, kmask_ref,
    ln1w_ref, ln1b_ref, wq_ref, wk_ref, wv_ref, wproj_ref, projb_ref,
    ln2w_ref, ln2b_ref, fc1w_ref, fc1b_ref, fc2w_ref, fc2b_ref,
    normw_ref, normb_ref,
    out_ref,
    x_scr,
    *, num_heads, head_dim, n_pad, bsz, scale):
    d = pl.program_id(1)
    bf = jnp.bfloat16

    # ---- grid step d == 0: fused prepare_tokens (patch embed + cls + pos) ----
    @pl.when(d == 0)
    def _():
        patches = patches_ref[0].astype(bf)                         # [M, C*p*p]
        tok = jnp.dot(patches, pw_ref[...], preferred_element_type=jnp.float32)
        # base carries cls+pos (row 0), pos+patch_bias (patch rows), zeros (pad rows)
        x_scr[...] = tok + base_ref[0]

    x = x_scr[...]                                                   # [M, D] f32
    M, D = x.shape

    # ------------------------------- attention --------------------------------
    h = _layernorm(x, ln1w_ref[0], ln1b_ref[0]).astype(bf)           # [M, D]
    kmask = kmask_ref[...].reshape(1, 1, n_pad)                      # additive key-pad mask

    y = jnp.zeros((M, D), jnp.float32)
    for hh in range(num_heads):           # static unroll; no lane slices, no concat
        q = jnp.dot(h, wq_ref[0, hh], preferred_element_type=jnp.float32)
        k = jnp.dot(h, wk_ref[0, hh], preferred_element_type=jnp.float32)
        v = jnp.dot(h, wv_ref[0, hh], preferred_element_type=jnp.float32)
        q3 = q.reshape(bsz, n_pad, head_dim).astype(bf)
        k3 = k.reshape(bsz, n_pad, head_dim).astype(bf)
        v3 = v.reshape(bsz, n_pad, head_dim).astype(bf)
        s = jnp.einsum("bqd,bkd->bqk", q3, k3,
                       preferred_element_type=jnp.float32) * scale + kmask
        m_ = jnp.max(s, axis=-1, keepdims=True)
        e = jnp.exp(s - m_)
        p_attn = e * pl.reciprocal(jnp.sum(e, axis=-1, keepdims=True), approx=True)
        o = jnp.einsum("bqk,bkd->bqd", p_attn.astype(bf), v3,
                       preferred_element_type=jnp.float32)           # [bsz, n_pad, hd]
        # proj(concat_h o_h) == sum_h o_h @ Wp[h*hd:(h+1)*hd, :]
        y = y + jnp.dot(o.reshape(M, head_dim).astype(bf), wproj_ref[0, hh],
                        preferred_element_type=jnp.float32)
    x = x + y + projb_ref[0]

    # ---------------------------------- MLP ------------------------------------
    h2 = _layernorm(x, ln2w_ref[0], ln2b_ref[0]).astype(bf)
    h2 = jnp.dot(h2, fc1w_ref[0], preferred_element_type=jnp.float32) + fc1b_ref[0]
    h2 = _gelu(h2).astype(bf)
    h2 = jnp.dot(h2, fc2w_ref[0], preferred_element_type=jnp.float32) + fc2b_ref[0]
    x = x + h2

    x_scr[...] = x

    # ---- last depth step: final LayerNorm on cls tokens, write the output -----
    @pl.when(d == pl.num_programs(1) - 1)
    def _():
        cls = x.reshape(bsz, n_pad, D)[:, 0:1, :].reshape(bsz, D)
        out_ref[0] = _layernorm(cls, normw_ref[...], normb_ref[...])


# ----------------------------- parameters & forward -----------------------------

def init_params(key, *, img_size, patch_size, in_chans, embed_dim, depth,
                num_heads, mlp_ratio):
    D = embed_dim
    hidden = int(D * mlp_ratio)
    num_patches = (img_size // patch_size) ** 2

    def tn(k, shape, std=0.02):
        return jax.random.truncated_normal(k, -2.0, 2.0, shape, jnp.float32) * std

    keys = jax.random.split(key, 4)
    params = {
        "cls_token": tn(keys[0], (1, 1, D)),
        "pos_embed": tn(keys[1], (1, num_patches + 1, D)),
        # Conv2d(in_chans, D, k=p, stride=p) as a linear over flattened (c, kh, kw)
        "patch_w": tn(keys[2], (in_chans * patch_size * patch_size, D)),
        "patch_b": jnp.zeros((1, D), jnp.float32),
        "norm_w": jnp.ones((1, D), jnp.float32),
        "norm_b": jnp.zeros((1, D), jnp.float32),
    }
    blocks = []
    bkeys = jax.random.split(keys[3], depth)
    for i in range(depth):
        k = jax.random.split(bkeys[i], 4)
        blocks.append({
            "ln1_w": jnp.ones((1, D), jnp.float32),
            "ln1_b": jnp.zeros((1, D), jnp.float32),
            "qkv_w": tn(k[0], (D, 3 * D)),       # qkv_bias=False (module default)
            "proj_w": tn(k[1], (D, D)),
            "proj_b": jnp.zeros((1, D), jnp.float32),
            "ln2_w": jnp.ones((1, D), jnp.float32),
            "ln2_b": jnp.zeros((1, D), jnp.float32),
            "fc1_w": tn(k[2], (D, hidden)),
            "fc1_b": jnp.zeros((1, hidden), jnp.float32),
            "fc2_w": tn(k[3], (hidden, D)),
            "fc2_b": jnp.zeros((1, D), jnp.float32),
        })
    params["blocks"] = blocks
    return params


def vit_forward(params, x, *, patch_size, num_heads, batch_shards=2):
    """x: [B, C, H, W] (NCHW).  Returns cls-token features [B, D]."""
    B, C, Himg, Wimg = x.shape
    p = patch_size
    hp, wp = Himg // p, Wimg // p
    Np = hp * wp
    N = Np + 1
    Npad = ((N + 7) // 8) * 8                       # pad tokens to sublane multiple
    D = params["patch_w"].shape[1]
    depth = len(params["blocks"])
    hd = D // num_heads
    Hmlp = params["blocks"][0]["fc1_w"].shape[1]
    Cpp = C * p * p

    nb = batch_shards if (B % batch_shards == 0) else 1   # parallel shards (v7x 2 TCs)
    Bs = B // nb
    M = Bs * Npad

    # ---------- glue: patch extraction, token padding, additive token base ----------
    patches = (x.reshape(B, C, hp, p, wp, p)
                 .transpose(0, 2, 4, 1, 3, 5)
                 .reshape(B, Np, Cpp))
    patches_pad = jnp.zeros((B, Npad, Cpp), jnp.float32).at[:, 1:1 + Np, :].set(patches)

    pos = params["pos_embed"][0]                           # [N, D]
    base = jnp.zeros((B, Npad, D), jnp.float32)
    base = base.at[:, 0, :].set(params["cls_token"][0, 0] + pos[0])
    base = base.at[:, 1:1 + Np, :].set(pos[1:] + params["patch_b"])

    kmask = jnp.where(jnp.arange(Npad) < N, 0.0, -1e30).astype(jnp.float32).reshape(1, Npad)

    # ---------- pack weights: depth-stacked, per-head split, bf16 matmul operands ----------
    bf = jnp.bfloat16

    def stack(name):
        return jnp.stack([blk[name] for blk in params["blocks"]])

    qkv = stack("qkv_w")                                   # [depth, D, 3D]

    def split_heads(w):                                    # [depth, D, D] -> [depth, H, D, hd]
        return w.reshape(depth, D, num_heads, hd).transpose(0, 2, 1, 3).astype(bf)

    wq = split_heads(qkv[:, :, 0:D])
    wk = split_heads(qkv[:, :, D:2 * D])
    wv = split_heads(qkv[:, :, 2 * D:3 * D])
    wproj = stack("proj_w").reshape(depth, num_heads, hd, D).astype(bf)

    ln1w, ln1b = stack("ln1_w"), stack("ln1_b")
    ln2w, ln2b = stack("ln2_w"), stack("ln2_b")
    projb = stack("proj_b")
    fc1w, fc1b = stack("fc1_w").astype(bf), stack("fc1_b")
    fc2w, fc2b = stack("fc2_w").astype(bf), stack("fc2_b")

    patches_k = patches_pad.reshape(nb, M, Cpp)
    base_k = base.reshape(nb, M, D)

    kern = functools.partial(
        vit_fused_kernel, num_heads=num_heads, head_dim=hd,
        n_pad=Npad, bsz=Bs, scale=hd ** -0.5)

    def per_depth3(shape):
        return pl.BlockSpec(shape, lambda b, d: (d, 0, 0))

    def per_depth4(shape):
        return pl.BlockSpec(shape, lambda b, d: (d, 0, 0, 0))

    def const2(shape):
        return pl.BlockSpec(shape, lambda b, d: (0, 0))

    out = pl.pallas_call(
        kern,
        grid=(nb, depth),
        out_shape=jax.ShapeDtypeStruct((nb, Bs, D), jnp.float32),
        in_specs=[
            pl.BlockSpec((1, M, Cpp), lambda b, d: (b, 0, 0)),   # padded patches
            const2((Cpp, D)),                                    # patch_w (bf16)
            pl.BlockSpec((1, M, D), lambda b, d: (b, 0, 0)),     # cls/pos/bias base
            const2((1, Npad)),                                   # key-pad mask
            per_depth3((1, 1, D)), per_depth3((1, 1, D)),        # ln1 w/b
            per_depth4((1, num_heads, D, hd)),                   # wq
            per_depth4((1, num_heads, D, hd)),                   # wk
            per_depth4((1, num_heads, D, hd)),                   # wv
            per_depth4((1, num_heads, hd, D)),                   # wproj
            per_depth3((1, 1, D)),                               # proj_b
            per_depth3((1, 1, D)), per_depth3((1, 1, D)),        # ln2 w/b
            per_depth3((1, D, Hmlp)), per_depth3((1, 1, Hmlp)),  # fc1 w/b
            per_depth3((1, Hmlp, D)), per_depth3((1, 1, D)),     # fc2 w/b
            const2((1, D)), const2((1, D)),                      # final norm w/b
        ],
        out_specs=pl.BlockSpec((1, Bs, D), lambda b, d: (b, 0, 0)),
        scratch_shapes=[pltpu.VMEM((M, D), jnp.float32)],        # carried activation
        compiler_params=pltpu.CompilerParams(
            dimension_semantics=("parallel", "arbitrary"),
            vmem_limit_bytes=32 * 1024 * 1024),
    )(patches_k, params["patch_w"].astype(bf), base_k, kmask,
      ln1w, ln1b, wq, wk, wv, wproj, projb, ln2w, ln2b,
      fc1w, fc1b, fc2w, fc2b, params["norm_w"], params["norm_b"])

    return out.reshape(B, D)


# ------------------------------------ main ------------------------------------

if __name__ == "__main__":
    # small config: img 16, patch 4 -> 16 patches + cls = 17 tokens (padded to 24),
    # dim 32, 4 heads, depth 2, mlp hidden 128
    cfg = dict(img_size=16, patch_size=4, in_chans=3, embed_dim=32, depth=2,
               num_heads=4, mlp_ratio=4.0)

    key = jax.random.PRNGKey(0)
    pkey, xkey = jax.random.split(key)
    params = init_params(pkey, **cfg)

    x = jax.random.normal(
        xkey, (2, cfg["in_chans"], cfg["img_size"], cfg["img_size"]), dtype=jnp.float32)

    fwd = jax.jit(functools.partial(vit_forward,
                                    patch_size=cfg["patch_size"],
                                    num_heads=cfg["num_heads"]))
    out = jax.block_until_ready(fwd(params, x))
    assert out.shape == (2, cfg["embed_dim"]) and out.dtype == jnp.float32
    assert bool(jnp.all(jnp.isfinite(out)))
    print("KERNEL_OK")
</pallas_src>

<mosaic_0001>
module attributes {stable_mosaic.version = 11 : i64} {
  func.func @vit_fused_kernel(%arg0: i32, %arg1: i32, %arg2: memref<1x24x48xf32, #tpu.memory_space<vmem>>, %arg3: memref<48x32xbf16, #tpu.memory_space<vmem>>, %arg4: memref<1x24x32xf32, #tpu.memory_space<vmem>>, %arg5: memref<1x24xf32, #tpu.memory_space<vmem>>, %arg6: memref<1x1x32xf32, #tpu.memory_space<vmem>>, %arg7: memref<1x1x32xf32, #tpu.memory_space<vmem>>, %arg8: memref<1x4x32x8xbf16, #tpu.memory_space<vmem>>, %arg9: memref<1x4x32x8xbf16, #tpu.memory_space<vmem>>, %arg10: memref<1x4x32x8xbf16, #tpu.memory_space<vmem>>, %arg11: memref<1x4x8x32xbf16, #tpu.memory_space<vmem>>, %arg12: memref<1x1x32xf32, #tpu.memory_space<vmem>>, %arg13: memref<1x1x32xf32, #tpu.memory_space<vmem>>, %arg14: memref<1x1x32xf32, #tpu.memory_space<vmem>>, %arg15: memref<1x32x128xbf16, #tpu.memory_space<vmem>>, %arg16: memref<1x1x128xf32, #tpu.memory_space<vmem>>, %arg17: memref<1x128x32xbf16, #tpu.memory_space<vmem>>, %arg18: memref<1x1x32xf32, #tpu.memory_space<vmem>>, %arg19: memref<1x32xf32, #tpu.memory_space<vmem>>, %arg20: memref<1x32xf32, #tpu.memory_space<vmem>>, %arg21: memref<1x1x32xf32, #tpu.memory_space<vmem>>, %arg22: memref<24x32xf32, #tpu.memory_space<vmem>>) attributes {dimension_semantics = [#tpu.dimension_semantics<parallel>, #tpu.dimension_semantics<arbitrary>], iteration_bounds = array<i64: 2, 2>, scalar_prefetch = 0 : i64, scratch_operands = 1 : i64, tpu.core_type = #tpu.core_type<tc>, window_params = [{transform_indices = @transform_0, window_bounds = array<i64: 1, 24, 48>}, {pipeline_mode = #tpu.pipeline_mode<synchronous>, transform_indices = @transform_1, window_bounds = array<i64: 48, 32>}, {transform_indices = @transform_2, window_bounds = array<i64: 1, 24, 32>}, {pipeline_mode = #tpu.pipeline_mode<synchronous>, transform_indices = @transform_3, window_bounds = array<i64: 1, 24>}, {transform_indices = @transform_4, window_bounds = array<i64: 1, 1, 32>}, {transform_indices = @transform_5, window_bounds = array<i64: 1, 1, 32>}, {transform_indices = @transform_6, window_bounds = array<i64: 1, 4, 32, 8>}, {transform_indices = @transform_7, window_bounds = array<i64: 1, 4, 32, 8>}, {transform_indices = @transform_8, window_bounds = array<i64: 1, 4, 32, 8>}, {transform_indices = @transform_9, window_bounds = array<i64: 1, 4, 8, 32>}, {transform_indices = @transform_10, window_bounds = array<i64: 1, 1, 32>}, {transform_indices = @transform_11, window_bounds = array<i64: 1, 1, 32>}, {transform_indices = @transform_12, window_bounds = array<i64: 1, 1, 32>}, {transform_indices = @transform_13, window_bounds = array<i64: 1, 32, 128>}, {transform_indices = @transform_14, window_bounds = array<i64: 1, 1, 128>}, {transform_indices = @transform_15, window_bounds = array<i64: 1, 128, 32>}, {transform_indices = @transform_16, window_bounds = array<i64: 1, 1, 32>}, {pipeline_mode = #tpu.pipeline_mode<synchronous>, transform_indices = @transform_17, window_bounds = array<i64: 1, 32>}, {pipeline_mode = #tpu.pipeline_mode<synchronous>, transform_indices = @transform_18, window_bounds = array<i64: 1, 32>}, {transform_indices = @transform_19, window_bounds = array<i64: 1, 1, 32>}]} {
    %c0_i32 = arith.constant 0 : i32
    %0 = arith.cmpi eq, %arg1, %c0_i32 : i32
    %1 = arith.extui %0 : i1 to i32
    %c0_i32_0 = arith.constant 0 : i32
    %2 = arith.cmpi ne, %1, %c0_i32_0 : i32
    scf.if %2 {
      %c0_147 = arith.constant 0 : index
      %c0_148 = arith.constant 0 : index
      %c0_149 = arith.constant 0 : index
      %251 = vector.load %arg2[%c0_147, %c0_148, %c0_149] : memref<1x24x48xf32, #tpu.memory_space<vmem>>, vector<1x24x48xf32>
      %252 = vector.shape_cast %251 : vector<1x24x48xf32> to vector<24x48xf32>
      %253 = arith.truncf %252 : vector<24x48xf32> to vector<24x48xbf16>
      %c0_150 = arith.constant 0 : index
      %c0_151 = arith.constant 0 : index
      %254 = vector.load %arg3[%c0_150, %c0_151] : memref<48x32xbf16, #tpu.memory_space<vmem>>, vector<48x32xbf16>
      %cst_152 = arith.constant dense<0.000000e+00> : vector<24x32xf32>
      %255 = tpu.matmul %253, %254, %cst_152 {dimension_numbers = #tpu.dot_dimension_numbers<[1], [0], [0], [1], [0, 0, 1, 1], [], []>} : vector<24x48xbf16>, vector<48x32xbf16>, vector<24x32xf32> -> vector<24x32xf32>
      %c0_153 = arith.constant 0 : index
      %c0_154 = arith.constant 0 : index
      %c0_155 = arith.constant 0 : index
      %256 = vector.load %arg4[%c0_153, %c0_154, %c0_155] : memref<1x24x32xf32, #tpu.memory_space<vmem>>, vector<1x24x32xf32>
      %257 = vector.shape_cast %256 : vector<1x24x32xf32> to vector<24x32xf32>
      %258 = arith.addf %255, %257 : vector<24x32xf32>
      %c0_156 = arith.constant 0 : index
      %c0_157 = arith.constant 0 : index
      %259 = vector.load %arg22[%c0_156, %c0_157] : memref<24x32xf32, #tpu.memory_space<vmem>>, vector<24x32xf32>
      tpu.vector_store %arg22[%c0_156, %c0_157], %258 {strides = array<i32>} : memref<24x32xf32, #tpu.memory_space<vmem>>, vector<24x32xf32>,
    } else {
    }
    %c0 = arith.constant 0 : index
    %c0_1 = arith.constant 0 : index
    %3 = vector.load %arg22[%c0, %c0_1] : memref<24x32xf32, #tpu.memory_space<vmem>>, vector<24x32xf32>
    %c0_2 = arith.constant 0 : index
    %c0_3 = arith.constant 0 : index
    %c0_4 = arith.constant 0 : index
    %4 = vector.load %arg6[%c0_2, %c0_3, %c0_4] : memref<1x1x32xf32, #tpu.memory_space<vmem>>, vector<1x1x32xf32>
    %5 = vector.shape_cast %4 : vector<1x1x32xf32> to vector<1x32xf32>
    %c0_5 = arith.constant 0 : index
    %c0_6 = arith.constant 0 : index
    %c0_7 = arith.constant 0 : index
    %6 = vector.load %arg7[%c0_5, %c0_6, %c0_7] : memref<1x1x32xf32, #tpu.memory_space<vmem>>, vector<1x1x32xf32>
    %7 = vector.shape_cast %6 : vector<1x1x32xf32> to vector<1x32xf32>
    %cst = arith.constant dense<0.000000e+00> : vector<24xf32>
    %8 = vector.multi_reduction <add>, %3, %cst [1] : vector<24x32xf32> to vector<24xf32>
    %9 = vector.shape_cast %8 : vector<24xf32> to vector<24x1xf32>
    %cst_8 = arith.constant 3.200000e+01 : f32
    %10 = vector.broadcast %cst_8 : f32 to vector<24x1xf32>
    %11 = arith.divf %9, %10 : vector<24x1xf32>
    %12 = vector.broadcast %11 : vector<24x1xf32> to vector<24x32xf32>
    %13 = arith.subf %3, %12 : vector<24x32xf32>
    %14 = arith.mulf %13, %13 : vector<24x32xf32>
    %cst_9 = arith.constant dense<0.000000e+00> : vector<24xf32>
    %15 = vector.multi_reduction <add>, %14, %cst_9 [1] : vector<24x32xf32> to vector<24xf32>
    %16 = vector.shape_cast %15 : vector<24xf32> to vector<24x1xf32>
    %cst_10 = arith.constant 3.200000e+01 : f32
    %17 = vector.broadcast %cst_10 : f32 to vector<24x1xf32>
    %18 = arith.divf %16, %17 : vector<24x1xf32>
    %19 = vector.broadcast %11 : vector<24x1xf32> to vector<24x32xf32>
    %20 = arith.subf %3, %19 : vector<24x32xf32>
    %cst_11 = arith.constant 9.99999974E-6 : f32
    %21 = vector.broadcast %cst_11 : f32 to vector<24x1xf32>
    %22 = arith.addf %18, %21 : vector<24x1xf32>
    %23 = math.rsqrt %22 : vector<24x1xf32>
    %24 = vector.broadcast %23 : vector<24x1xf32> to vector<24x32xf32>
    %25 = arith.mulf %20, %24 : vector<24x32xf32>
    %26 = vector.broadcast %5 : vector<1x32xf32> to vector<24x32xf32>
    %27 = arith.mulf %25, %26 : vector<24x32xf32>
    %28 = vector.broadcast %7 : vector<1x32xf32> to vector<24x32xf32>
    %29 = arith.addf %27, %28 : vector<24x32xf32>
    %30 = arith.truncf %29 : vector<24x32xf32> to vector<24x32xbf16>
    %c0_12 = arith.constant 0 : index
    %c0_13 = arith.constant 0 : index
    %31 = vector.load %arg5[%c0_12, %c0_13] : memref<1x24xf32, #tpu.memory_space<vmem>>, vector<1x24xf32>
    %32 = vector.shape_cast %31 : vector<1x24xf32> to vector<1x1x24xf32>
    %cst_14 = arith.constant 0.000000e+00 : f32
    %33 = vector.broadcast %cst_14 : f32 to vector<24x32xf32>
    %c0_15 = arith.constant 0 : index
    %c0_16 = arith.constant 0 : index
    %c0_17 = arith.constant 0 : index
    %c0_18 = arith.constant 0 : index
    %34 = vector.load %arg8[%c0_15, %c0_16, %c0_17, %c0_18] : memref<1x4x32x8xbf16, #tpu.memory_space<vmem>>, vector<1x1x32x8xbf16>
    %35 = vector.shape_cast %34 : vector<1x1x32x8xbf16> to vector<32x8xbf16>
    %cst_19 = arith.constant dense<0.000000e+00> : vector<24x8xf32>
    %36 = tpu.matmul %30, %35, %cst_19 {dimension_numbers = #tpu.dot_dimension_numbers<[1], [0], [0], [1], [0, 0, 1, 1], [], []>} : vector<24x32xbf16>, vector<32x8xbf16>, vector<24x8xf32> -> vector<24x8xf32>
    %c0_20 = arith.constant 0 : index
    %c0_21 = arith.constant 0 : index
    %c0_22 = arith.constant 0 : index
    %c0_23 = arith.constant 0 : index
    %37 = vector.load %arg9[%c0_20, %c0_21, %c0_22, %c0_23] : memref<1x4x32x8xbf16, #tpu.memory_space<vmem>>, vector<1x1x32x8xbf16>
    %38 = vector.shape_cast %37 : vector<1x1x32x8xbf16> to vector<32x8xbf16>
    %cst_24 = arith.constant dense<0.000000e+00> : vector<24x8xf32>
    %39 = tpu.matmul %30, %38, %cst_24 {dimension_numbers = #tpu.dot_dimension_numbers<[1], [0], [0], [1], [0, 0, 1, 1], [], []>} : vector<24x32xbf16>, vector<32x8xbf16>, vector<24x8xf32> -> vector<24x8xf32>
    %c0_25 = arith.constant 0 : index
    %c0_26 = arith.constant 0 : index
    %c0_27 = arith.constant 0 : index
    %c0_28 = arith.constant 0 : index
    %40 = vector.load %arg10[%c0_25, %c0_26, %c0_27, %c0_28] : memref<1x4x32x8xbf16, #tpu.memory_space<vmem>>, vector<1x1x32x8xbf16>
    %41 = vector.shape_cast %40 : vector<1x1x32x8xbf16> to vector<32x8xbf16>
    %cst_29 = arith.constant dense<0.000000e+00> : vector<24x8xf32>
    %42 = tpu.matmul %30, %41, %cst_29 {dimension_numbers = #tpu.dot_dimension_numbers<[1], [0], [0], [1], [0, 0, 1, 1], [], []>} : vector<24x32xbf16>, vector<32x8xbf16>, vector<24x8xf32> -> vector<24x8xf32>
    %43 = vector.shape_cast %36 : vector<24x8xf32> to vector<1x24x8xf32>
    %44 = arith.truncf %43 : vector<1x24x8xf32> to vector<1x24x8xbf16>
    %45 = vector.shape_cast %39 : vector<24x8xf32> to vector<1x24x8xf32>
    %46 = arith.truncf %45 : vector<1x24x8xf32> to vector<1x24x8xbf16>
    %47 = vector.shape_cast %42 : vector<24x8xf32> to vector<1x24x8xf32>
    %48 = arith.truncf %47 : vector<1x24x8xf32> to vector<1x24x8xbf16>
    "tpu.trace_start"() <{level = 10 : i32, message = "bqd,bkd->bqk"}> : () -> ()
    %cst_30 = arith.constant dense<0.000000e+00> : vector<1x24x24xf32>
    %49 = tpu.matmul %44, %46, %cst_30 {dimension_numbers = #tpu.dot_dimension_numbers<[2], [2], [1], [1], [0, 0, 0, 1, 1, 1], [0], [0]>} : vector<1x24x8xbf16>, vector<1x24x8xbf16>, vector<1x24x24xf32> -> vector<1x24x24xf32>
    "tpu.trace_stop"() : () -> ()
    %cst_31 = arith.constant 0.353553385 : f32
    %50 = vector.broadcast %cst_31 : f32 to vector<1x24x24xf32>
    %51 = arith.mulf %49, %50 : vector<1x24x24xf32>
    %52 = vector.broadcast %32 : vector<1x1x24xf32> to vector<1x24x24xf32>
    %53 = arith.addf %51, %52 : vector<1x24x24xf32>
    %cst_32 = arith.constant dense<0xFF800000> : vector<1x24xf32>
    %54 = vector.multi_reduction <maximumf>, %53, %cst_32 [2] : vector<1x24x24xf32> to vector<1x24xf32>
    %55 = vector.shape_cast %54 : vector<1x24xf32> to vector<1x24x1xf32>
    %56 = vector.broadcast %55 : vector<1x24x1xf32> to vector<1x24x24xf32>
    %57 = arith.subf %53, %56 : vector<1x24x24xf32>
    %58 = math.exp %57 : vector<1x24x24xf32>
    %cst_33 = arith.constant dense<0.000000e+00> : vector<1x24xf32>
    %59 = vector.multi_reduction <add>, %58, %cst_33 [2] : vector<1x24x24xf32> to vector<1x24xf32>
    %60 = vector.shape_cast %59 : vector<1x24xf32> to vector<1x24x1xf32>
    %61 = tpu.reciprocal %60 {approx = true} : vector<1x24x1xf32> -> vector<1x24x1xf32>
    %62 = vector.broadcast %61 : vector<1x24x1xf32> to vector<1x24x24xf32>
    %63 = arith.mulf %58, %62 : vector<1x24x24xf32>
    %64 = arith.truncf %63 : vector<1x24x24xf32> to vector<1x24x24xbf16>
    "tpu.trace_start"() <{level = 10 : i32, message = "bqk,bkd->bqd"}> : () -> ()
    %cst_34 = arith.constant dense<0.000000e+00> : vector<1x24x8xf32>
    %65 = tpu.matmul %64, %48, %cst_34 {dimension_numbers = #tpu.dot_dimension_numbers<[2], [1], [1], [2], [0, 0, 0, 1, 1, 2], [0], [0]>} : vector<1x24x24xbf16>, vector<1x24x8xbf16>, vector<1x24x8xf32> -> vector<1x24x8xf32>
    "tpu.trace_stop"() : () -> ()
    %66 = vector.shape_cast %65 : vector<1x24x8xf32> to vector<24x8xf32>
    %67 = arith.truncf %66 : vector<24x8xf32> to vector<24x8xbf16>
    %c0_35 = arith.constant 0 : index
    %c0_36 = arith.constant 0 : index
    %c0_37 = arith.constant 0 : index
    %c0_38 = arith.constant 0 : index
    %68 = vector.load %arg11[%c0_35, %c0_36, %c0_37, %c0_38] : memref<1x4x8x32xbf16, #tpu.memory_space<vmem>>, vector<1x1x8x32xbf16>
    %69 = vector.shape_cast %68 : vector<1x1x8x32xbf16> to vector<8x32xbf16>
    %cst_39 = arith.constant dense<0.000000e+00> : vector<24x32xf32>
    %70 = tpu.matmul %67, %69, %cst_39 {dimension_numbers = #tpu.dot_dimension_numbers<[1], [0], [0], [1], [0, 0, 1, 1], [], []>} : vector<24x8xbf16>, vector<8x32xbf16>, vector<24x32xf32> -> vector<24x32xf32>
    %71 = arith.addf %33, %70 : vector<24x32xf32>
    %c0_40 = arith.constant 0 : index
    %c1 = arith.constant 1 : index
    %c0_41 = arith.constant 0 : index
    %c0_42 = arith.constant 0 : index
    %72 = vector.load %arg8[%c0_40, %c1, %c0_41, %c0_42] : memref<1x4x32x8xbf16, #tpu.memory_space<vmem>>, vector<1x1x32x8xbf16>
    %73 = vector.shape_cast %72 : vector<1x1x32x8xbf16> to vector<32x8xbf16>
    %cst_43 = arith.constant dense<0.000000e+00> : vector<24x8xf32>
    %74 = tpu.matmul %30, %73, %cst_43 {dimension_numbers = #tpu.dot_dimension_numbers<[1], [0], [0], [1], [0, 0, 1, 1], [], []>} : vector<24x32xbf16>, vector<32x8xbf16>, vector<24x8xf32> -> vector<24x8xf32>
    %c0_44 = arith.constant 0 : index
    %c1_45 = arith.constant 1 : index
    %c0_46 = arith.constant 0 : index
    %c0_47 = arith.constant 0 : index
    %75 = vector.load %arg9[%c0_44, %c1_45, %c0_46, %c0_47] : memref<1x4x32x8xbf16, #tpu.memory_space<vmem>>, vector<1x1x32x8xbf16>
    %76 = vector.shape_cast %75 : vector<1x1x32x8xbf16> to vector<32x8xbf16>
    %cst_48 = arith.constant dense<0.000000e+00> : vector<24x8xf32>
    %77 = tpu.matmul %30, %76, %cst_48 {dimension_numbers = #tpu.dot_dimension_numbers<[1], [0], [0], [1], [0, 0, 1, 1], [], []>} : vector<24x32xbf16>, vector<32x8xbf16>, vector<24x8xf32> -> vector<24x8xf32>
    %c0_49 = arith.constant 0 : index
    %c1_50 = arith.constant 1 : index
    %c0_51 = arith.constant 0 : index
    %c0_52 = arith.constant 0 : index
    %78 = vector.load %arg10[%c0_49, %c1_50, %c0_51, %c0_52] : memref<1x4x32x8xbf16, #tpu.memory_space<vmem>>, vector<1x1x32x8xbf16>
    %79 = vector.shape_cast %78 : vector<1x1x32x8xbf16> to vector<32x8xbf16>
    %cst_53 = arith.constant dense<0.000000e+00> : vector<24x8xf32>
    %80 = tpu.matmul %30, %79, %cst_53 {dimension_numbers = #tpu.dot_dimension_numbers<[1], [0], [0], [1], [0, 0, 1, 1], [], []>} : vector<24x32xbf16>, vector<32x8xbf16>, vector<24x8xf32> -> vector<24x8xf32>
    %81 = vector.shape_cast %74 : vector<24x8xf32> to vector<1x24x8xf32>
    %82 = arith.truncf %81 : vector<1x24x8xf32> to vector<1x24x8xbf16>
    %83 = vector.shape_cast %77 : vector<24x8xf32> to vector<1x24x8xf32>
    %84 = arith.truncf %83 : vector<1x24x8xf32> to vector<1x24x8xbf16>
    %85 = vector.shape_cast %80 : vector<24x8xf32> to vector<1x24x8xf32>
    %86 = arith.truncf %85 : vector<1x24x8xf32> to vector<1x24x8xbf16>
    "tpu.trace_start"() <{level = 10 : i32, message = "bqd,bkd->bqk"}> : () -> ()
    %cst_54 = arith.constant dense<0.000000e+00> : vector<1x24x24xf32>
    %87 = tpu.matmul %82, %84, %cst_54 {dimension_numbers = #tpu.dot_dimension_numbers<[2], [2], [1], [1], [0, 0, 0, 1, 1, 1], [0], [0]>} : vector<1x24x8xbf16>, vector<1x24x8xbf16>, vector<1x24x24xf32> -> vector<1x24x24xf32>
    "tpu.trace_stop"() : () -> ()
    %cst_55 = arith.constant 0.353553385 : f32
    %88 = vector.broadcast %cst_55 : f32 to vector<1x24x24xf32>
    %89 = arith.mulf %87, %88 : vector<1x24x24xf32>
    %90 = vector.broadcast %32 : vector<1x1x24xf32> to vector<1x24x24xf32>
    %91 = arith.addf %89, %90 : vector<1x24x24xf32>
    %cst_56 = arith.constant dense<0xFF800000> : vector<1x24xf32>
    %92 = vector.multi_reduction <maximumf>, %91, %cst_56 [2] : vector<1x24x24xf32> to vector<1x24xf32>
    %93 = vector.shape_cast %92 : vector<1x24xf32> to vector<1x24x1xf32>
    %94 = vector.broadcast %93 : vector<1x24x1xf32> to vector<1x24x24xf32>
    %95 = arith.subf %91, %94 : vector<1x24x24xf32>
    %96 = math.exp %95 : vector<1x24x24xf32>
    %cst_57 = arith.constant dense<0.000000e+00> : vector<1x24xf32>
    %97 = vector.multi_reduction <add>, %96, %cst_57 [2] : vector<1x24x24xf32> to vector<1x24xf32>
    %98 = vector.shape_cast %97 : vector<1x24xf32> to vector<1x24x1xf32>
    %99 = tpu.reciprocal %98 {approx = true} : vector<1x24x1xf32> -> vector<1x24x1xf32>
    %100 = vector.broadcast %99 : vector<1x24x1xf32> to vector<1x24x24xf32>
    %101 = arith.mulf %96, %100 : vector<1x24x24xf32>
    %102 = arith.truncf %101 : vector<1x24x24xf32> to vector<1x24x24xbf16>
    "tpu.trace_start"() <{level = 10 : i32, message = "bqk,bkd->bqd"}> : () -> ()
    %cst_58 = arith.constant dense<0.000000e+00> : vector<1x24x8xf32>
    %103 = tpu.matmul %102, %86, %cst_58 {dimension_numbers = #tpu.dot_dimension_numbers<[2], [1], [1], [2], [0, 0, 0, 1, 1, 2], [0], [0]>} : vector<1x24x24xbf16>, vector<1x24x8xbf16>, vector<1x24x8xf32> -> vector<1x24x8xf32>
    "tpu.trace_stop"() : () -> ()
    %104 = vector.shape_cast %103 : vector<1x24x8xf32> to vector<24x8xf32>
    %105 = arith.truncf %104 : vector<24x8xf32> to vector<24x8xbf16>
    %c0_59 = arith.constant 0 : index
    %c1_60 = arith.constant 1 : index
    %c0_61 = arith.constant 0 : index
    %c0_62 = arith.constant 0 : index
    %106 = vector.load %arg11[%c0_59, %c1_60, %c0_61, %c0_62] : memref<1x4x8x32xbf16, #tpu.memory_space<vmem>>, vector<1x1x8x32xbf16>
    %107 = vector.shape_cast %106 : vector<1x1x8x32xbf16> to vector<8x32xbf16>
    %cst_63 = arith.constant dense<0.000000e+00> : vector<24x32xf32>
    %108 = tpu.matmul %105, %107, %cst_63 {dimension_numbers = #tpu.dot_dimension_numbers<[1], [0], [0], [1], [0, 0, 1, 1], [], []>} : vector<24x8xbf16>, vector<8x32xbf16>, vector<24x32xf32> -> vector<24x32xf32>
    %109 = arith.addf %71, %108 : vector<24x32xf32>
    %c0_64 = arith.constant 0 : index
    %c2 = arith.constant 2 : index
    %c0_65 = arith.constant 0 : index
    %c0_66 = arith.constant 0 : index
    %110 = vector.load %arg8[%c0_64, %c2, %c0_65, %c0_66] : memref<1x4x32x8xbf16, #tpu.memory_space<vmem>>, vector<1x1x32x8xbf16>
    %111 = vector.shape_cast %110 : vector<1x1x32x8xbf16> to vector<32x8xbf16>
    %cst_67 = arith.constant dense<0.000000e+00> : vector<24x8xf32>
    %112 = tpu.matmul %30, %111, %cst_67 {dimension_numbers = #tpu.dot_dimension_numbers<[1], [0], [0], [1], [0, 0, 1, 1], [], []>} : vector<24x32xbf16>, vector<32x8xbf16>, vector<24x8xf32> -> vector<24x8xf32>
    %c0_68 = arith.constant 0 : index
    %c2_69 = arith.constant 2 : index
    %c0_70 = arith.constant 0 : index
    %c0_71 = arith.constant 0 : index
    %113 = vector.load %arg9[%c0_68, %c2_69, %c0_70, %c0_71] : memref<1x4x32x8xbf16, #tpu.memory_space<vmem>>, vector<1x1x32x8xbf16>
    %114 = vector.shape_cast %113 : vector<1x1x32x8xbf16> to vector<32x8xbf16>
    %cst_72 = arith.constant dense<0.000000e+00> : vector<24x8xf32>
    %115 = tpu.matmul %30, %114, %cst_72 {dimension_numbers = #tpu.dot_dimension_numbers<[1], [0], [0], [1], [0, 0, 1, 1], [], []>} : vector<24x32xbf16>, vector<32x8xbf16>, vector<24x8xf32> -> vector<24x8xf32>
    %c0_73 = arith.constant 0 : index
    %c2_74 = arith.constant 2 : index
    %c0_75 = arith.constant 0 : index
    %c0_76 = arith.constant 0 : index
    %116 = vector.load %arg10[%c0_73, %c2_74, %c0_75, %c0_76] : memref<1x4x32x8xbf16, #tpu.memory_space<vmem>>, vector<1x1x32x8xbf16>
    %117 = vector.shape_cast %116 : vector<1x1x32x8xbf16> to vector<32x8xbf16>
    %cst_77 = arith.constant dense<0.000000e+00> : vector<24x8xf32>
    %118 = tpu.matmul %30, %117, %cst_77 {dimension_numbers = #tpu.dot_dimension_numbers<[1], [0], [0], [1], [0, 0, 1, 1], [], []>} : vector<24x32xbf16>, vector<32x8xbf16>, vector<24x8xf32> -> vector<24x8xf32>
    %119 = vector.shape_cast %112 : vector<24x8xf32> to vector<1x24x8xf32>
    %120 = arith.truncf %119 : vector<1x24x8xf32> to vector<1x24x8xbf16>
    %121 = vector.shape_cast %115 : vector<24x8xf32> to vector<1x24x8xf32>
    %122 = arith.truncf %121 : vector<1x24x8xf32> to vector<1x24x8xbf16>
    %123 = vector.shape_cast %118 : vector<24x8xf32> to vector<1x24x8xf32>
    %124 = arith.truncf %123 : vector<1x24x8xf32> to vector<1x24x8xbf16>
    "tpu.trace_start"() <{level = 10 : i32, message = "bqd,bkd->bqk"}> : () -> ()
    %cst_78 = arith.constant dense<0.000000e+00> : vector<1x24x24xf32>
    %125 = tpu.matmul %120, %122, %cst_78 {dimension_numbers = #tpu.dot_dimension_numbers<[2], [2], [1], [1], [0, 0, 0, 1, 1, 1], [0], [0]>} : vector<1x24x8xbf16>, vector<1x24x8xbf16>, vector<1x24x24xf32> -> vector<1x24x24xf32>
    "tpu.trace_stop"() : () -> ()
    %cst_79 = arith.constant 0.353553385 : f32
    %126 = vector.broadcast %cst_79 : f32 to vector<1x24x24xf32>
    %127 = arith.mulf %125, %126 : vector<1x24x24xf32>
    %128 = vector.broadcast %32 : vector<1x1x24xf32> to vector<1x24x24xf32>
    %129 = arith.addf %127, %128 : vector<1x24x24xf32>
    %cst_80 = arith.constant dense<0xFF800000> : vector<1x24xf32>
    %130 = vector.multi_reduction <maximumf>, %129, %cst_80 [2] : vector<1x24x24xf32> to vector<1x24xf32>
    %131 = vector.shape_cast %130 : vector<1x24xf32> to vector<1x24x1xf32>
    %132 = vector.broadcast %131 : vector<1x24x1xf32> to vector<1x24x24xf32>
    %133 = arith.subf %129, %132 : vector<1x24x24xf32>
    %134 = math.exp %133 : vector<1x24x24xf32>
    %cst_81 = arith.constant dense<0.000000e+00> : vector<1x24xf32>
    %135 = vector.multi_reduction <add>, %134, %cst_81 [2] : vector<1x24x24xf32> to vector<1x24xf32>
    %136 = vector.shape_cast %135 : vector<1x24xf32> to vector<1x24x1xf32>
    %137 = tpu.reciprocal %136 {approx = true} : vector<1x24x1xf32> -> vector<1x24x1xf32>
    %138 = vector.broadcast %137 : vector<1x24x1xf32> to vector<1x24x24xf32>
    %139 = arith.mulf %134, %138 : vector<1x24x24xf32>
    %140 = arith.truncf %139 : vector<1x24x24xf32> to vector<1x24x24xbf16>
    "tpu.trace_start"() <{level = 10 : i32, message = "bqk,bkd->bqd"}> : () -> ()
    %cst_82 = arith.constant dense<0.000000e+00> : vector<1x24x8xf32>
    %141 = tpu.matmul %140, %124, %cst_82 {dimension_numbers = #tpu.dot_dimension_numbers<[2], [1], [1], [2], [0, 0, 0, 1, 1, 2], [0], [0]>} : vector<1x24x24xbf16>, vector<1x24x8xbf16>, vector<1x24x8xf32> -> vector<1x24x8xf32>
    "tpu.trace_stop"() : () -> ()
    %142 = vector.shape_cast %141 : vector<1x24x8xf32> to vector<24x8xf32>
    %143 = arith.truncf %142 : vector<24x8xf32> to vector<24x8xbf16>
    %c0_83 = arith.constant 0 : index
    %c2_84 = arith.constant 2 : index
    %c0_85 = arith.constant 0 : index
    %c0_86 = arith.constant 0 : index
    %144 = vector.load %arg11[%c0_83, %c2_84, %c0_85, %c0_86] : memref<1x4x8x32xbf16, #tpu.memory_space<vmem>>, vector<1x1x8x32xbf16>
    %145 = vector.shape_cast %144 : vector<1x1x8x32xbf16> to vector<8x32xbf16>
    %cst_87 = arith.constant dense<0.000000e+00> : vector<24x32xf32>
    %146 = tpu.matmul %143, %145, %cst_87 {dimension_numbers = #tpu.dot_dimension_numbers<[1], [0], [0], [1], [0, 0, 1, 1], [], []>} : vector<24x8xbf16>, vector<8x32xbf16>, vector<24x32xf32> -> vector<24x32xf32>
    %147 = arith.addf %109, %146 : vector<24x32xf32>
    %c0_88 = arith.constant 0 : index
    %c3 = arith.constant 3 : index
    %c0_89 = arith.constant 0 : index
    %c0_90 = arith.constant 0 : index
    %148 = vector.load %arg8[%c0_88, %c3, %c0_89, %c0_90] : memref<1x4x32x8xbf16, #tpu.memory_space<vmem>>, vector<1x1x32x8xbf16>
    %149 = vector.shape_cast %148 : vector<1x1x32x8xbf16> to vector<32x8xbf16>
    %cst_91 = arith.constant dense<0.000000e+00> : vector<24x8xf32>
    %150 = tpu.matmul %30, %149, %cst_91 {dimension_numbers = #tpu.dot_dimension_numbers<[1], [0], [0], [1], [0, 0, 1, 1], [], []>} : vector<24x32xbf16>, vector<32x8xbf16>, vector<24x8xf32> -> vector<24x8xf32>
    %c0_92 = arith.constant 0 : index
    %c3_93 = arith.constant 3 : index
    %c0_94 = arith.constant 0 : index
    %c0_95 = arith.constant 0 : index
    %151 = vector.load %arg9[%c0_92, %c3_93, %c0_94, %c0_95] : memref<1x4x32x8xbf16, #tpu.memory_space<vmem>>, vector<1x1x32x8xbf16>
    %152 = vector.shape_cast %151 : vector<1x1x32x8xbf16> to vector<32x8xbf16>
    %cst_96 = arith.constant dense<0.000000e+00> : vector<24x8xf32>
    %153 = tpu.matmul %30, %152, %cst_96 {dimension_numbers = #tpu.dot_dimension_numbers<[1], [0], [0], [1], [0, 0, 1, 1], [], []>} : vector<24x32xbf16>, vector<32x8xbf16>, vector<24x8xf32> -> vector<24x8xf32>
    %c0_97 = arith.constant 0 : index
    %c3_98 = arith.constant 3 : index
    %c0_99 = arith.constant 0 : index
    %c0_100 = arith.constant 0 : index
    %154 = vector.load %arg10[%c0_97, %c3_98, %c0_99, %c0_100] : memref<1x4x32x8xbf16, #tpu.memory_space<vmem>>, vector<1x1x32x8xbf16>
    %155 = vector.shape_cast %154 : vector<1x1x32x8xbf16> to vector<32x8xbf16>
    %cst_101 = arith.constant dense<0.000000e+00> : vector<24x8xf32>
    %156 = tpu.matmul %30, %155, %cst_101 {dimension_numbers = #tpu.dot_dimension_numbers<[1], [0], [0], [1], [0, 0, 1, 1], [], []>} : vector<24x32xbf16>, vector<32x8xbf16>, vector<24x8xf32> -> vector<24x8xf32>
    %157 = vector.shape_cast %150 : vector<24x8xf32> to vector<1x24x8xf32>
    %158 = arith.truncf %157 : vector<1x24x8xf32> to vector<1x24x8xbf16>
    %159 = vector.shape_cast %153 : vector<24x8xf32> to vector<1x24x8xf32>
    %160 = arith.truncf %159 : vector<1x24x8xf32> to vector<1x24x8xbf16>
    %161 = vector.shape_cast %156 : vector<24x8xf32> to vector<1x24x8xf32>
    %162 = arith.truncf %161 : vector<1x24x8xf32> to vector<1x24x8xbf16>
    "tpu.trace_start"() <{level = 10 : i32, message = "bqd,bkd->bqk"}> : () -> ()
    %cst_102 = arith.constant dense<0.000000e+00> : vector<1x24x24xf32>
    %163 = tpu.matmul %158, %160, %cst_102 {dimension_numbers = #tpu.dot_dimension_numbers<[2], [2], [1], [1], [0, 0, 0, 1, 1, 1], [0], [0]>} : vector<1x24x8xbf16>, vector<1x24x8xbf16>, vector<1x24x24xf32> -> vector<1x24x24xf32>
    "tpu.trace_stop"() : () -> ()
    %cst_103 = arith.constant 0.353553385 : f32
    %164 = vector.broadcast %cst_103 : f32 to vector<1x24x24xf32>
    %165 = arith.mulf %163, %164 : vector<1x24x24xf32>
    %166 = vector.broadcast %32 : vector<1x1x24xf32> to vector<1x24x24xf32>
    %167 = arith.addf %165, %166 : vector<1x24x24xf32>
    %cst_104 = arith.constant dense<0xFF800000> : vector<1x24xf32>
    %168 = vector.multi_reduction <maximumf>, %167, %cst_104 [2] : vector<1x24x24xf32> to vector<1x24xf32>
    %169 = vector.shape_cast %168 : vector<1x24xf32> to vector<1x24x1xf32>
    %170 = vector.broadcast %169 : vector<1x24x1xf32> to vector<1x24x24xf32>
    %171 = arith.subf %167, %170 : vector<1x24x24xf32>
    %172 = math.exp %171 : vector<1x24x24xf32>
    %cst_105 = arith.constant dense<0.000000e+00> : vector<1x24xf32>
    %173 = vector.multi_reduction <add>, %172, %cst_105 [2] : vector<1x24x24xf32> to vector<1x24xf32>
    %174 = vector.shape_cast %173 : vector<1x24xf32> to vector<1x24x1xf32>
    %175 = tpu.reciprocal %174 {approx = true} : vector<1x24x1xf32> -> vector<1x24x1xf32>
    %176 = vector.broadcast %175 : vector<1x24x1xf32> to vector<1x24x24xf32>
    %177 = arith.mulf %172, %176 : vector<1x24x24xf32>
    %178 = arith.truncf %177 : vector<1x24x24xf32> to vector<1x24x24xbf16>
    "tpu.trace_start"() <{level = 10 : i32, message = "bqk,bkd->bqd"}> : () -> ()
    %cst_106 = arith.constant dense<0.000000e+00> : vector<1x24x8xf32>
    %179 = tpu.matmul %178, %162, %cst_106 {dimension_numbers = #tpu.dot_dimension_numbers<[2], [1], [1], [2], [0, 0, 0, 1, 1, 2], [0], [0]>} : vector<1x24x24xbf16>, vector<1x24x8xbf16>, vector<1x24x8xf32> -> vector<1x24x8xf32>
    "tpu.trace_stop"() : () -> ()
    %180 = vector.shape_cast %179 : vector<1x24x8xf32> to vector<24x8xf32>
    %181 = arith.truncf %180 : vector<24x8xf32> to vector<24x8xbf16>
    %c0_107 = arith.constant 0 : index
    %c3_108 = arith.constant 3 : index
    %c0_109 = arith.constant 0 : index
    %c0_110 = arith.constant 0 : index
    %182 = vector.load %arg11[%c0_107, %c3_108, %c0_109, %c0_110] : memref<1x4x8x32xbf16, #tpu.memory_space<vmem>>, vector<1x1x8x32xbf16>
    %183 = vector.shape_cast %182 : vector<1x1x8x32xbf16> to vector<8x32xbf16>
    %cst_111 = arith.constant dense<0.000000e+00> : vector<24x32xf32>
    %184 = tpu.matmul %181, %183, %cst_111 {dimension_numbers = #tpu.dot_dimension_numbers<[1], [0], [0], [1], [0, 0, 1, 1], [], []>} : vector<24x8xbf16>, vector<8x32xbf16>, vector<24x32xf32> -> vector<24x32xf32>
    %185 = arith.addf %147, %184 : vector<24x32xf32>
    %186 = arith.addf %3, %185 : vector<24x32xf32>
    %c0_112 = arith.constant 0 : index
    %c0_113 = arith.constant 0 : index
    %c0_114 = arith.constant 0 : index
    %187 = vector.load %arg12[%c0_112, %c0_113, %c0_114] : memref<1x1x32xf32, #tpu.memory_space<vmem>>, vector<1x1x32xf32>
    %188 = vector.shape_cast %187 : vector<1x1x32xf32> to vector<1x32xf32>
    %189 = vector.broadcast %188 : vector<1x32xf32> to vector<24x32xf32>
    %190 = arith.addf %186, %189 : vector<24x32xf32>
    %c0_115 = arith.constant 0 : index
    %c0_116 = arith.constant 0 : index
    %c0_117 = arith.constant 0 : index
    %191 = vector.load %arg13[%c0_115, %c0_116, %c0_117] : memref<1x1x32xf32, #tpu.memory_space<vmem>>, vector<1x1x32xf32>
    %192 = vector.shape_cast %191 : vector<1x1x32xf32> to vector<1x32xf32>
    %c0_118 = arith.constant 0 : index
    %c0_119 = arith.constant 0 : index
    %c0_120 = arith.constant 0 : index
    %193 = vector.load %arg14[%c0_118, %c0_119, %c0_120] : memref<1x1x32xf32, #tpu.memory_space<vmem>>, vector<1x1x32xf32>
    %194 = vector.shape_cast %193 : vector<1x1x32xf32> to vector<1x32xf32>
    %cst_121 = arith.constant dense<0.000000e+00> : vector<24xf32>
    %195 = vector.multi_reduction <add>, %190, %cst_121 [1] : vector<24x32xf32> to vector<24xf32>
    %196 = vector.shape_cast %195 : vector<24xf32> to vector<24x1xf32>
    %cst_122 = arith.constant 3.200000e+01 : f32
    %197 = vector.broadcast %cst_122 : f32 to vector<24x1xf32>
    %198 = arith.divf %196, %197 : vector<24x1xf32>
    %199 = vector.broadcast %198 : vector<24x1xf32> to vector<24x32xf32>
    %200 = arith.subf %190, %199 : vector<24x32xf32>
    %201 = arith.mulf %200, %200 : vector<24x32xf32>
    %cst_123 = arith.constant dense<0.000000e+00> : vector<24xf32>
    %202 = vector.multi_reduction <add>, %201, %cst_123 [1] : vector<24x32xf32> to vector<24xf32>
    %203 = vector.shape_cast %202 : vector<24xf32> to vector<24x1xf32>
    %cst_124 = arith.constant 3.200000e+01 : f32
    %204 = vector.broadcast %cst_124 : f32 to vector<24x1xf32>
    %205 = arith.divf %203, %204 : vector<24x1xf32>
    %206 = vector.broadcast %198 : vector<24x1xf32> to vector<24x32xf32>
    %207 = arith.subf %190, %206 : vector<24x32xf32>
    %cst_125 = arith.constant 9.99999974E-6 : f32
    %208 = vector.broadcast %cst_125 : f32 to vector<24x1xf32>
    %209 = arith.addf %205, %208 : vector<24x1xf32>
    %210 = math.rsqrt %209 : vector<24x1xf32>
    %211 = vector.broadcast %210 : vector<24x1xf32> to vector<24x32xf32>
    %212 = arith.mulf %207, %211 : vector<24x32xf32>
    %213 = vector.broadcast %192 : vector<1x32xf32> to vector<24x32xf32>
    %214 = arith.mulf %212, %213 : vector<24x32xf32>
    %215 = vector.broadcast %194 : vector<1x32xf32> to vector<24x32xf32>
    %216 = arith.addf %214, %215 : vector<24x32xf32>
    %217 = arith.truncf %216 : vector<24x32xf32> to vector<24x32xbf16>
    %c0_126 = arith.constant 0 : index
    %c0_127 = arith.constant 0 : index
    %c0_128 = arith.constant 0 : index
    %218 = vector.load %arg15[%c0_126, %c0_127, %c0_128] : memref<1x32x128xbf16, #tpu.memory_space<vmem>>, vector<1x32x128xbf16>
    %219 = vector.shape_cast %218 : vector<1x32x128xbf16> to vector<32x128xbf16>
    %cst_129 = arith.constant dense<0.000000e+00> : vector<24x128xf32>
    %220 = tpu.matmul %217, %219, %cst_129 {dimension_numbers = #tpu.dot_dimension_numbers<[1], [0], [0], [1], [0, 0, 1, 1], [], []>} : vector<24x32xbf16>, vector<32x128xbf16>, vector<24x128xf32> -> vector<24x128xf32>
    %c0_130 = arith.constant 0 : index
    %c0_131 = arith.constant 0 : index
    %c0_132 = arith.constant 0 : index
    %221 = vector.load %arg16[%c0_130, %c0_131, %c0_132] : memref<1x1x128xf32, #tpu.memory_space<vmem>>, vector<1x1x128xf32>
    %222 = vector.shape_cast %221 : vector<1x1x128xf32> to vector<1x128xf32>
    %223 = vector.broadcast %222 : vector<1x128xf32> to vector<24x128xf32>
    %224 = arith.addf %220, %223 : vector<24x128xf32>
    %cst_133 = arith.constant 5.000000e-01 : f32
    %225 = vector.broadcast %cst_133 : f32 to vector<24x128xf32>
    %226 = arith.mulf %225, %224 : vector<24x128xf32>
    %227 = arith.mulf %224, %224 : vector<24x128xf32>
    %228 = arith.mulf %227, %224 : vector<24x128xf32>
    %cst_134 = arith.constant 4.471500e-02 : f32
    %229 = vector.broadcast %cst_134 : f32 to vector<24x128xf32>
    %230 = arith.mulf %229, %228 : vector<24x128xf32>
    %231 = arith.addf %224, %230 : vector<24x128xf32>
    %cst_135 = arith.constant 0.797884583 : f32
    %232 = vector.broadcast %cst_135 : f32 to vector<24x128xf32>
    %233 = arith.mulf %232, %231 : vector<24x128xf32>
    %234 = math.tanh %233 : vector<24x128xf32>
    %cst_136 = arith.constant 1.000000e+00 : f32
    %235 = vector.broadcast %cst_136 : f32 to vector<24x128xf32>
    %236 = arith.addf %235, %234 : vector<24x128xf32>
    %237 = arith.mulf %226, %236 : vector<24x128xf32>
    %238 = arith.truncf %237 : vector<24x128xf32> to vector<24x128xbf16>
    %c0_137 = arith.constant 0 : index
    %c0_138 = arith.constant 0 : index
    %c0_139 = arith.constant 0 : index
    %239 = vector.load %arg17[%c0_137, %c0_138, %c0_139] : memref<1x128x32xbf16, #tpu.memory_space<vmem>>, vector<1x128x32xbf16>
    %240 = vector.shape_cast %239 : vector<1x128x32xbf16> to vector<128x32xbf16>
    %cst_140 = arith.constant dense<0.000000e+00> : vector<24x32xf32>
    %241 = tpu.matmul %238, %240, %cst_140 {dimension_numbers = #tpu.dot_dimension_numbers<[1], [0], [0], [1], [0, 0, 1, 1], [], []>} : vector<24x128xbf16>, vector<128x32xbf16>, vector<24x32xf32> -> vector<24x32xf32>
    %c0_141 = arith.constant 0 : index
    %c0_142 = arith.constant 0 : index
    %c0_143 = arith.constant 0 : index
    %242 = vector.load %arg18[%c0_141, %c0_142, %c0_143] : memref<1x1x32xf32, #tpu.memory_space<vmem>>, vector<1x1x32xf32>
    %243 = vector.shape_cast %242 : vector<1x1x32xf32> to vector<1x32xf32>
    %244 = vector.broadcast %243 : vector<1x32xf32> to vector<24x32xf32>
    %245 = arith.addf %241, %244 : vector<24x32xf32>
    %246 = arith.addf %190, %245 : vector<24x32xf32>
    %c0_144 = arith.constant 0 : index
    %c0_145 = arith.constant 0 : index
    %247 = vector.load %arg22[%c0_144, %c0_145] : memref<24x32xf32, #tpu.memory_space<vmem>>, vector<24x32xf32>
    tpu.vector_store %arg22[%c0_144, %c0_145], %246 {strides = array<i32>} : memref<24x32xf32, #tpu.memory_space<vmem>>, vector<24x32xf32>,
    %c1_i32 = arith.constant 1 : i32
    %248 = arith.cmpi eq, %arg1, %c1_i32 : i32
    %249 = arith.extui %248 : i1 to i32
    %c0_i32_146 = arith.constant 0 : i32
    %250 = arith.cmpi ne, %249, %c0_i32_146 : i32
    scf.if %250 {
      %251 = vector.shape_cast %246 : vector<24x32xf32> to vector<1x24x32xf32>
      %252 = vector.extract_strided_slice %251 {offsets = [0, 0, 0], sizes = [1, 1, 32], strides = [1, 1, 1]} : vector<1x24x32xf32> to vector<1x1x32xf32>
      %253 = vector.shape_cast %252 : vector<1x1x32xf32> to vector<1x32xf32>
      %c0_147 = arith.constant 0 : index
      %c0_148 = arith.constant 0 : index
      %254 = vector.load %arg19[%c0_147, %c0_148] : memref<1x32xf32, #tpu.memory_space<vmem>>, vector<1x32xf32>
      %c0_149 = arith.constant 0 : index
      %c0_150 = arith.constant 0 : index
      %255 = vector.load %arg20[%c0_149, %c0_150] : memref<1x32xf32, #tpu.memory_space<vmem>>, vector<1x32xf32>
      %cst_151 = arith.constant dense<0.000000e+00> : vector<1xf32>
      %256 = vector.multi_reduction <add>, %253, %cst_151 [1] : vector<1x32xf32> to vector<1xf32>
      %257 = vector.shape_cast %256 : vector<1xf32> to vector<1x1xf32>
      %cst_152 = arith.constant 3.200000e+01 : f32
      %258 = vector.broadcast %cst_152 : f32 to vector<1x1xf32>
      %259 = arith.divf %257, %258 : vector<1x1xf32>
      %260 = vector.broadcast %259 : vector<1x1xf32> to vector<1x32xf32>
      %261 = arith.subf %253, %260 : vector<1x32xf32>
      %262 = arith.mulf %261, %261 : vector<1x32xf32>
      %cst_153 = arith.constant dense<0.000000e+00> : vector<1xf32>
      %263 = vector.multi_reduction <add>, %262, %cst_153 [1] : vector<1x32xf32> to vector<1xf32>
      %264 = vector.shape_cast %263 : vector<1xf32> to vector<1x1xf32>
      %cst_154 = arith.constant 3.200000e+01 : f32
      %265 = vector.broadcast %cst_154 : f32 to vector<1x1xf32>
      %266 = arith.divf %264, %265 : vector<1x1xf32>
      %267 = vector.broadcast %259 : vector<1x1xf32> to vector<1x32xf32>
      %268 = arith.subf %253, %267 : vector<1x32xf32>
      %cst_155 = arith.constant 9.99999974E-6 : f32
      %269 = vector.broadcast %cst_155 : f32 to vector<1x1xf32>
      %270 = arith.addf %266, %269 : vector<1x1xf32>
      %271 = math.rsqrt %270 : vector<1x1xf32>
      %272 = vector.broadcast %271 : vector<1x1xf32> to vector<1x32xf32>
      %273 = arith.mulf %268, %272 : vector<1x32xf32>
      %274 = arith.mulf %273, %254 : vector<1x32xf32>
      %275 = arith.addf %274, %255 : vector<1x32xf32>
      %c0_156 = arith.constant 0 : index
      %c0_157 = arith.constant 0 : index
      %c0_158 = arith.constant 0 : index
      %276 = vector.load %arg21[%c0_156, %c0_157, %c0_158] : memref<1x1x32xf32, #tpu.memory_space<vmem>>, vector<1x1x32xf32>
      %277 = vector.shape_cast %276 : vector<1x1x32xf32> to vector<1x32xf32>
      %278 = vector.shape_cast %275 : vector<1x32xf32> to vector<1x1x32xf32>
      tpu.vector_store %arg21[%c0_156, %c0_157, %c0_158], %278 {strides = array<i32>} : memref<1x1x32xf32, #tpu.memory_space<vmem>>, vector<1x1x32xf32>,
    } else {
    }
    return
  }
  func.func @transform_0(%arg0: i32, %arg1: i32) -> (i32, i32, i32) {
    %c0_i32 = arith.constant 0 : i32
    %c0_i32_0 = arith.constant 0 : i32
    %c0_i32_1 = arith.constant 0 : i32
    return %arg0, %c0_i32, %c0_i32_0 : i32, i32, i32
  }
  func.func @transform_1(%arg0: i32, %arg1: i32) -> (i32, i32) {
    %c0_i32 = arith.constant 0 : i32
    %c0_i32_0 = arith.constant 0 : i32
    %c0_i32_1 = arith.constant 0 : i32
    return %c0_i32, %c0_i32_0 : i32, i32
  }
  func.func @transform_2(%arg0: i32, %arg1: i32) -> (i32, i32, i32) {
    %c0_i32 = arith.constant 0 : i32
    %c0_i32_0 = arith.constant 0 : i32
    %c0_i32_1 = arith.constant 0 : i32
    return %arg0, %c0_i32, %c0_i32_0 : i32, i32, i32
  }
  func.func @transform_3(%arg0: i32, %arg1: i32) -> (i32, i32) {
    %c0_i32 = arith.constant 0 : i32
    %c0_i32_0 = arith.constant 0 : i32
    %c0_i32_1 = arith.constant 0 : i32
    return %c0_i32, %c0_i32_0 : i32, i32
  }
  func.func @transform_4(%arg0: i32, %arg1: i32) -> (i32, i32, i32) {
    %c0_i32 = arith.constant 0 : i32
    %c0_i32_0 = arith.constant 0 : i32
    %c0_i32_1 = arith.constant 0 : i32
    return %arg1, %c0_i32, %c0_i32_0 : i32, i32, i32
  }
  func.func @transform_5(%arg0: i32, %arg1: i32) -> (i32, i32, i32) {
    %c0_i32 = arith.constant 0 : i32
    %c0_i32_0 = arith.constant 0 : i32
    %c0_i32_1 = arith.constant 0 : i32
    return %arg1, %c0_i32, %c0_i32_0 : i32, i32, i32
  }
  func.func @transform_6(%arg0: i32, %arg1: i32) -> (i32, i32, i32, i32) {
    %c0_i32 = arith.constant 0 : i32
    %c0_i32_0 = arith.constant 0 : i32
    %c0_i32_1 = arith.constant 0 : i32
    %c0_i32_2 = arith.constant 0 : i32
    return %arg1, %c0_i32, %c0_i32_0, %c0_i32_1 : i32, i32, i32, i32
  }
  func.func @transform_7(%arg0: i32, %arg1: i32) -> (i32, i32, i32, i32) {
    %c0_i32 = arith.constant 0 : i32
    %c0_i32_0 = arith.constant 0 : i32
    %c0_i32_1 = arith.constant 0 : i32
    %c0_i32_2 = arith.constant 0 : i32
    return %arg1, %c0_i32, %c0_i32_0, %c0_i32_1 : i32, i32, i32, i32
  }
  func.func @transform_8(%arg0: i32, %arg1: i32) -> (i32, i32, i32, i32) {
    %c0_i32 = arith.constant 0 : i32
    %c0_i32_0 = arith.constant 0 : i32
    %c0_i32_1 = arith.constant 0 : i32
    %c0_i32_2 = arith.constant 0 : i32
    return %arg1, %c0_i32, %c0_i32_0, %c0_i32_1 : i32, i32, i32, i32
  }
  func.func @transform_9(%arg0: i32, %arg1: i32) -> (i32, i32, i32, i32) {
    %c0_i32 = arith.constant 0 : i32
    %c0_i32_0 = arith.constant 0 : i32
    %c0_i32_1 = arith.constant 0 : i32
    %c0_i32_2 = arith.constant 0 : i32
    return %arg1, %c0_i32, %c0_i32_0, %c0_i32_1 : i32, i32, i32, i32
  }
  func.func @transform_10(%arg0: i32, %arg1: i32) -> (i32, i32, i32) {
    %c0_i32 = arith.constant 0 : i32
    %c0_i32_0 = arith.constant 0 : i32
    %c0_i32_1 = arith.constant 0 : i32
    return %arg1, %c0_i32, %c0_i32_0 : i32, i32, i32
  }
  func.func @transform_11(%arg0: i32, %arg1: i32) -> (i32, i32, i32) {
    %c0_i32 = arith.constant 0 : i32
    %c0_i32_0 = arith.constant 0 : i32
    %c0_i32_1 = arith.constant 0 : i32
    return %arg1, %c0_i32, %c0_i32_0 : i32, i32, i32
  }
  func.func @transform_12(%arg0: i32, %arg1: i32) -> (i32, i32, i32) {
    %c0_i32 = arith.constant 0 : i32
    %c0_i32_0 = arith.constant 0 : i32
    %c0_i32_1 = arith.constant 0 : i32
    return %arg1, %c0_i32, %c0_i32_0 : i32, i32, i32
  }
  func.func @transform_13(%arg0: i32, %arg1: i32) -> (i32, i32, i32) {
    %c0_i32 = arith.constant 0 : i32
    %c0_i32_0 = arith.constant 0 : i32
    %c0_i32_1 = arith.constant 0 : i32
    return %arg1, %c0_i32, %c0_i32_0 : i32, i32, i32
  }
  func.func @transform_14(%arg0: i32, %arg1: i32) -> (i32, i32, i32) {
    %c0_i32 = arith.constant 0 : i32
    %c0_i32_0 = arith.constant 0 : i32
    %c0_i32_1 = arith.constant 0 : i32
    return %arg1, %c0_i32, %c0_i32_0 : i32, i32, i32
  }
  func.func @transform_15(%arg0: i32, %arg1: i32) -> (i32, i32, i32) {
    %c0_i32 = arith.constant 0 : i32
    %c0_i32_0 = arith.constant 0 : i32
    %c0_i32_1 = arith.constant 0 : i32
    return %arg1, %c0_i32, %c0_i32_0 : i32, i32, i32
  }
  func.func @transform_16(%arg0: i32, %arg1: i32) -> (i32, i32, i32) {
    %c0_i32 = arith.constant 0 : i32
    %c0_i32_0 = arith.constant 0 : i32
    %c0_i32_1 = arith.constant 0 : i32
    return %arg1, %c0_i32, %c0_i32_0 : i32, i32, i32
  }
  func.func @transform_17(%arg0: i32, %arg1: i32) -> (i32, i32) {
    %c0_i32 = arith.constant 0 : i32
    %c0_i32_0 = arith.constant 0 : i32
    %c0_i32_1 = arith.constant 0 : i32
    return %c0_i32, %c0_i32_0 : i32, i32
  }
  func.func @transform_18(%arg0: i32, %arg1: i32) -> (i32, i32) {
    %c0_i32 = arith.constant 0 : i32
    %c0_i32_0 = arith.constant 0 : i32
    %c0_i32_1 = arith.constant 0 : i32
    return %c0_i32, %c0_i32_0 : i32, i32
  }
  func.func @transform_19(%arg0: i32, %arg1: i32) -> (i32, i32, i32) {
    %c0_i32 = arith.constant 0 : i32
    %c0_i32_0 = arith.constant 0 : i32
    %c0_i32_1 = arith.constant 0 : i32
    return %arg0, %c0_i32, %c0_i32_0 : i32, i32, i32
  }
}

</mosaic_0001>

<bundles_post_ra>
// kernel: vit_forward.1
= control target key start
LH: loop header
LB: loop body
LE: loop exit
PB: predicated region body
PF: predicated region fallthrough
CT: control target
= control target key end

     0   :  { %s3862_s0 = inlined_call_operand.vmem [shape: f32[2,24,48], index: 0, kind: input, shape index: {}]   ;;  %s3863_s1 = inlined_call_operand.vmem [shape: bf16[48,32], index: 1, kind: input, shape index: {}]   ;;  %s3864_s2 = inlined_call_operand.vmem [shape: f32[2,24,32], index: 2, kind: input, shape index: {}]   ;;  %s3865_s3 = inlined_call_operand.vmem [shape: f32[1,24], index: 3, kind: input, shape index: {}]   ;;  %s3866_s4 = inlined_call_operand.vmem [shape: f32[2,1,32], index: 4, kind: input, shape index: {}]   ;;  %s3867_s5 = inlined_call_operand.vmem [shape: f32[2,1,32], index: 5, kind: input, shape index: {}]   ;;  %s3868_s6 = inlined_call_operand.vmem [shape: bf16[2,4,32,8], index: 6, kind: input, shape index: {}]   ;;  %s3869_s7 = inlined_call_operand.vmem [shape: bf16[2,4,32,8], index: 7, kind: input, shape index: {}]   ;;  %s3870_s8 = inlined_call_operand.vmem [shape: bf16[2,4,32,8], index: 8, kind: input, shape index: {}]   ;;  %s3871_s9 = inlined_call_operand.vmem [shape: bf16[2,4,8,32], index: 9, kind: input, shape index: {}]   ;;  %s3872_s10 = inlined_call_operand.vmem [shape: f32[2,1,32], index: 10, kind: input, shape index: {}]   ;;  %s3873_s11 = inlined_call_operand.vmem [shape: f32[2,1,32], index: 11, kind: input, shape index: {}]   ;;  %s3874_s12 = inlined_call_operand.vmem [shape: f32[2,1,32], index: 12, kind: input, shape index: {}]   ;;  %s3875_s13 = inlined_call_operand.vmem [shape: bf16[2,32,128], index: 13, kind: input, shape index: {}]   ;;  %s3876_s14 = inlined_call_operand.vmem [shape: f32[2,1,128], index: 14, kind: input, shape index: {}]   ;;  %s3877_s15 = inlined_call_operand.vmem [shape: bf16[2,128,32], index: 15, kind: input, shape index: {}]   ;;  %s3878_s16 = inlined_call_operand.vmem [shape: f32[2,1,32], index: 16, kind: input, shape index: {}]   ;;  %s3879_s17 = inlined_call_operand.vmem [shape: f32[1,32], index: 17, kind: input, shape index: {}]   ;;  %s3880_s18 = inlined_call_operand.vmem [shape: f32[1,32], index: 18, kind: input, shape index: {}]   ;;  %s3881_s19 = inlined_call_operand.hbm [shape: f32[2,1,32], index: 19, kind: output, shape index: {}]  }
   0x1   :  { %3897 = sst [smem:[#allocation19_spill]] %s3862_s0 }
   0x2   :  { %3898 = sst [smem:[#allocation20_spill]] %s3863_s1 }
   0x3   :  { %3899 = sst [smem:[#allocation21_spill]] %s3864_s2 }
   0x4   :  { %3900 = sst [smem:[#allocation22_spill]] %s3865_s3 }
   0x5   :  { %3901 = sst [smem:[#allocation23_spill]] %s3867_s5 }
   0x6   :  { %3902 = sst [smem:[#allocation24_spill]] %s3868_s6 }
   0x7   :  { %3903 = sst [smem:[#allocation25_spill]] %s3869_s7 }
   0x8   :  { %3904 = sst [smem:[#allocation26_spill]] %s3870_s8 }
   0x9   :  { %3905 = sst [smem:[#allocation27_spill]] %s3871_s9 }
   0xa   :  { %3906 = sst [smem:[#allocation28_spill]] %s3873_s11 }
   0xb   :  { %3907 = sst [smem:[#allocation29_spill]] %s3877_s15 }
   0xc   :  { %3908 = sst [smem:[#allocation30_spill]] %s3878_s16 }
   0xd   :  { %3909 = sst [smem:[#allocation31_spill]] %s3879_s17 }
   0xe   :  { %3910 = sst [smem:[#allocation32_spill]] %s3880_s18 }
   0xf   :  { %3911 = sst [smem:[#allocation33_spill]] %s3881_s19 }
  0x10   :  { %24 = vsyncpa [#allocation4], 0 }
  0x11   :  { %26 = vsyncpa [#allocation4 + $0x1], 0  ;;  %s3310_s0 = smov 0   ;;  %s3312_s30 = smov 0  }
  0x12   :  { %s3314_s20 = smov 0   ;;  %s3316_s21 = smov 0  }
  0x13   :  { %s3318_s1 = smov 0   ;;  %s3320_s22 = smov 0  }
  0x14   :  { %s3322_s2 = smov 0   ;;  %s3324_s23 = smov 0  }
  0x15 LB: > { %3912 = sst [smem:[#allocation6_spill]] %s3179_s0  ;;  %s2647_s24 = sadd.s32 4294967295, %s3207_s23   ;;  %s3207_s23 = sphi %s3324_s23, %s32_s23   ;;  %s3203_s2 = sphi %s3322_s2, %s3965_s2   ;;  %s3199_s22 = sphi %s3320_s22, %s3964_s22   ;;  %s3195_s1 = sphi %s3318_s1, %s3963_s1   ;;  %s3191_s21 = sphi %s3316_s21, %s3962_s21   ;;  %s3187_s20 = sphi %s3314_s20, %s3961_s20   ;;  %s3183_s30 = sphi %s3312_s30, %s3967_s30   ;;  %s3179_s0 = sphi %s3310_s0, %s3966_s0  }
  0x16   : > { %3913 = sst [smem:[#allocation7_spill]] %s3187_s20  ;;  %s2648_s25 = sadd.s32 4294967294, %s3207_s23  }
  0x17   : > { %3914 = sst [smem:[#allocation8_spill]] %s3191_s21  ;;  %s41_s3 = sadd.s32 1, %s3199_s22 }
  0x18   : > { %3915 = sst [smem:[#allocation9_spill]] %s3195_s1  ;;  %p42_p0 = scmp.ge.s32.totalorder %s41_s3, 2 }
  0x19   : > { %3916 = sst [smem:[#allocation10_spill]] %s3199_s22  ;;  %s44_s26 = sadd.s32 1, %s3203_s2 }
  0x1a   : > { %3917 = sst [smem:[#allocation11_spill]] %s3203_s2  ;;  %p535_p1 = scmp.ne.s32.totalorder %s3187_s20, %s3183_s30 }
  0x1b   : > { %3918 = sst [smem:[#allocation12_spill]] %s3207_s23  ;;  %p536_p2 = scmp.eq.s32.totalorder %s2647_s24, 3 }
  0x1c   : > { %s3969_s3 = smov (%p42_p0, %s41_s3), 0  ;;  %s3971_s26 = smov (!%p42_p0, %s44_s26), %s3203_s2 }
  0x1d   : > { %3919 = sst [smem:[#allocation13_spill]] %s3969_s3  ;;  %p3359_p3 = por %p536_p2, %p535_p1 }
  0x1e   : > { %p541_p4 = scmp.ne.s32.totalorder %s3183_s30, %s3179_s0  ;;  %p46_p5 = scmp.ge.s32.totalorder %s3971_s26, 2 }
  0x1f   : > { %s3920_s27 = scalar_select %p3359_p3, 1, 0 }
  0x20   : > { %p542_p6 = scmp.eq.s32.totalorder %s2648_s25, 3  ;;  %p2651_p7 = scmp.ge.s32.totalorder %s3207_s23, 1 }
  0x21   : > { %3921 = sst [smem:[#allocation14_spill]] %s3920_s27  ;;  %p678_p8 = scmp.lt.s32.totalorder %s3207_s23, 5 }
  0x22   : > { %s3973_s26 = smov (%p46_p5, %s3971_s26), 0  ;;  %p3369_p9 = por %p542_p6, %p541_p4 }
  0x23   : > { %3922 = sst [smem:[#allocation15_spill]] %s3973_s26  ;;  %p679_p10 = pnand %p2651_p7, %p678_p8 }
  0x24   : > { %s3923_s28 = scalar_select %p3369_p9, 1, 0 }
  0x25   : > { %s522_s29 = ssub.s32 %s3203_s2, %s3973_s26  ;;  %s525_s24 = sadd.s32 1, %s3187_s20 }
  0x26   : > { %3924 = sst [smem:[#allocation16_spill]] %s3923_s28  ;;  %p523_p11 = scmp.eq.s32.totalorder %s522_s29, 0 }
  0x27   : > { %682 = sbr.rel (%p679_p10) target bundleno = 3811 (0xee3), region = 96 }
  0x28   : > { %s3377_s3 = scalar_select %p523_p11, %s3187_s20, %s525_s24  }
  0x2a   : > { %3925 = sst [smem:[#allocation17_spill]] %s3377_s3 }
  0x2c   : > { %p789_p12 = scmp.lt.s32.totalorder %s3195_s1, 1  ;;  %p799_p13 = scmp.lt.s32.totalorder %s3191_s21, 1 }
  0x2d   : > { %s3927_s27 = sld [smem:[#allocation19_spill]] }
  0x2e   : > { %s790_s22 = scalar_select %p789_p12, %s3195_s1, 1 }
  0x2f   : > { %s3384_s0 = scalar_select %p799_p13, %s3191_s21, 1 }
  0x30   : > { %s2959_s29 = smul.u32 24, %s790_s22  ;;  %s3928_s17 = sld [smem:[#allocation21_spill]] }
  0x31   : > { %s2909_s22 = sshll.u32 %s3384_s0, 6  ;;  %s2912_s16 = sshll.u32 %s3384_s0, 4 }
  0x32   : > { %s3929_s6 = sld [smem:[#allocation24_spill]] }
  0x33   : > { %s793_s19 = scalar_lea.vmem %s3927_s27, %s2959_s29  ;;  %s3930_s7 = sld [smem:[#allocation25_spill]] }
  0x34   : > { %s3931_s8 = sld [smem:[#allocation26_spill]] }
  0x35   : > { %s3932_s9 = sld [smem:[#allocation27_spill]] }
  0x36   : > { %s3400_s21 = scalar_lea.vmem %s3928_s17, %s2959_s29  ;;  %s3935_s29 = sld [smem:[#allocation29_spill]] }
  0x37   : > { %s3936_s3 = sld [smem:[#allocation30_spill]] }
  0x38   : > { %s3407_s24 = scalar_lea.vmem %s3929_s6, %s2909_s22  ;;  %s3938_s5 = sld [smem:[#allocation8_spill]] }
  0x39   : > { %s3412_s20 = scalar_lea.vmem %s3930_s7, %s2909_s22  ;;  %s3937_s7 = sand.u32 1, %s3183_s30  }
  0x3a   : > { %s3417_s27 = scalar_lea.vmem %s3931_s8, %s2909_s22  ;;  %s3439_s8 = scalar_lea.vmem %s3875_s13, %s2912_s16 }
  0x3b   : > { %s3422_s1 = scalar_lea.vmem %s3932_s9, %s2912_s16  ;;  %s841_s9 = scalar_lea.vmem %s3876_s14, %s3384_s0 }
  0x3c   : > { %3933 = sst [smem:[#allocation18_spill]] %s3422_s1  ;;  %s3448_s15 = scalar_lea.vmem %s3935_s29, %s2909_s22 }
  0x3d   : > { %s849_s11 = scalar_lea.vmem %s3936_s3, %s3384_s0  ;;  %s3456_s25 = scalar_lea.vmem [#allocation3], %s3937_s7 }
  0x3e   : > { %p2666_p0 = scmp.ne.s32.totalorder %s3938_s5, 0 }
  0x3f   : > { %s3939_s28 = sld [smem:[#allocation20_spill]] (!%p2666_p0) }
  0x40   : > { %854 = sbr.rel (%p2666_p0) target bundleno = 218 (0xda), region = 100 }
  0x45   : > { %v2917_v0 = vld [vmem:[%s3939_s28 + $0x10] sm:$0xff]  ;;  %v2916_v1 = vld [vmem:[%s3939_s28 + $0x8] sm:$0xff]  ;;  %v2915_v2 = vld [vmem:[%s3939_s28] sm:$0xff]  ;;  %vm887_vm0 = vcmask 392192   ;;  %vm912_vm1 = vcmask 261120  }
  0x46   : > { %899 = vmatpush.bf16.msra.mxu0 %v2917_v0  ;;  %2952 = vmatpush.bf16.msra.mxu1 %v2917_v0  ;;  %v855_v3 = vld [vmem:[%s793_s19] sm:$0xff]  ;;  %v856_v4 = vld [vmem:[%s793_s19 + $0x8] sm:$0xff]  ;;  %v857_v5 = vld [vmem:[%s793_s19 + $0x10] sm:$0xff] }
  0x47   : > { %v858_v6 = vpack.c.bf16 %v856_v4, %v855_v3  ;;  %v859_v7 = vpack.c.bf16 %v857_v5, %v857_v5  ;;  %v866_v8 = vld [vmem:[%s3400_s21] sm:$0xff]  ;;  %v868_v9 = vld [vmem:[%s3400_s21 + $0x10] sm:$0xff]  ;;  %v867_v14 = vld [vmem:[%s3400_s21 + $0x8] sm:$0xff] }
  0x4a   : > { %900 = vmatpush.bf16.msra.mxu0 %v2916_v1  ;;  %2953 = vmatpush.bf16.msra.mxu1 %v2916_v1 }
  0x4e   : > { %901 = vmatpush.bf16.msra.mxu0 %v2915_v2  ;;  %2954 = vmatpush.bf16.msra.mxu1 %v2915_v2 }
  0x51   : > { %2679 = vmatmul.msk.bf16.vlgmr.msra.gmra.mxu0 %vm887_vm0, %v858_v6  ;;  %2680 = vmatmul.msk.bf16.vlgmr.msra.gmra.mxu1 %vm887_vm0, %v859_v7 }
  0xce   : > { %v903_v10 = vpop.f32.mrf.mxu0  ;;  %v908_v11 = vpop.f32.mrf.mxu1 }
  0xcf   : > { %v904_v12 = vadd.f32 %v903_v10, %v866_v8  ;;  %v909_v13 = vadd.f32 %v908_v11, %v868_v9 }
  0xd1   : > { %913 = vst.msk [vmem:[#allocation2] sm:$0xff] %vm912_vm1, %v904_v12 }
  0xd2   : > { %915 = vst.msk [vmem:[#allocation2 + $0x10] sm:$0xff] %vm912_vm1, %v909_v13 }
  0xd6   : > { %v905_v15 = vpop.f32.mrf.mxu0  ;;  %v910_v16 = vpop.f32.mrf.mxu1 }
  0xd7   : > { %v906_v17 = vadd.f32 %v905_v15, %v867_v14 }
  0xd9   : > { %914 = vst.msk [vmem:[#allocation2 + $0x8] sm:$0xff] %vm912_vm1, %v906_v17 }
  0xda PF: > { %v918_v18 = vld [vmem:[#allocation2 + $0x10] sm:$0xff]  ;;  %vm921_vm2 = vcmask 261120   ;;  %v916_v22 = vld [vmem:[#allocation2] sm:$0xff]  ;;  %v3209_v24 = vmov 32.0   ;;  %v2919_v46 = vld [vmem:[%s3407_s24 + $0x8] sm:$0xff]  ;;  %s3940_s21 = scalar_lea.vmem %s3866_s4, %s3384_s0  ;;  %s3941_s29 = sld [smem:[#allocation23_spill]] }
  0xdb   : > { %v928_v20 = vsel %vm921_vm2, %v918_v18, 0.0  ;;  %v922_v23 = vsel %vm921_vm2, %v916_v22, 0.0  ;;  %3040 = vrcp.f32 %v3209_v24  ;;  %v2921_v47 = vld [vmem:[%s3412_s20 + $0x8] sm:$0xff]  ;;  %2955 = vmatpush.bf16.msra.mxu2 %v2919_v46  ;;  %1038 = vmatpush.bf16.msra.mxu0 %v2919_v46  ;;  %v2918_v48 = vld [vmem:[%s3407_s24] sm:$0xff]  ;;  %v2925_v63 = vld [vmem:[%s3407_s24 + $0x18] sm:$0xff]  ;;  %vm1143_vm13 = vcmask 64512   ;;  %s3948_s19 = scalar_lea.vmem %s3874_s12, %s3384_s0 }
  0xdc   : > { %929 = vadd.xlane.f32.xlu0 %v928_v20  ;;  %2957 = vmatpush.bf16.msra.mxu3 %v2921_v47  ;;  %v2920_v49 = vld [vmem:[%s3412_s20] sm:$0xff]  ;;  %v2923_v53 = vld [vmem:[%s3417_s27 + $0x8] sm:$0xff]  ;;  %v2924_v2 = vld [vmem:[%s3407_s24 + $0x10] sm:$0xff]  ;;  %vm1243_vm14 = vcmask 1043456   ;;  %s3943_s16 = sld [smem:[#allocation22_spill]]  ;;  %vm1183_vm15 = vcmask 195584  }
  0xdd   : > { %1072 = vmatpush.bf16.msra.mxu1 %v2921_v47  ;;  %v2922_v56 = vld [vmem:[%s3417_s27] sm:$0xff]  ;;  %s3944_s23 = sld [smem:[#allocation18_spill]] }
  0xde   : > { %v3032_v7 = vld [vmem:[%s3940_s21] ss:$0 sm:$0xff]  ;;  %s3946_s22 = sld [smem:[#allocation28_spill]] }
  0xdf   : > { %2956 = vmatpush.bf16.msra.mxu2 %v2918_v48  ;;  %1039 = vmatpush.bf16.msra.mxu0 %v2918_v48 }
  0xe0   : > { %v917_v19 = vld [vmem:[#allocation2 + $0x8] sm:$0xff]  ;;  %2958 = vmatpush.bf16.msra.mxu3 %v2920_v49  ;;  %s3942_s6 = scalar_lea.vmem %s3941_s29, %s3384_s0 }
  0xe1   : > { %v925_v21 = vsel %vm921_vm2, %v917_v19, 0.0  ;;  %v3041_v25 = vpop.eup %3040  ;;  %1073 = vmatpush.bf16.msra.mxu1 %v2920_v49  ;;  %v3033_v10 = vld [vmem:[%s3942_s6] ss:$0 sm:$0xff] }
  0xe2   : > { %926 = vadd.xlane.f32.xlu1 %v925_v21  ;;  %v932_v26 = vmul.f32 32.0, %v3041_v25  ;;  %vm936_vm3 = vweird.f32 %v3041_v25 }
  0xe3   : > { %1106 = vmatpush.bf16.msrb.mxu2 %v2923_v53 }
  0xe4   : > { %923 = vadd.xlane.f32.xlu0 %v922_v23  ;;  %v933_v27 = vsub.f32 1.0, %v932_v26  ;;  %v2927_v23 = vld [vmem:[%s3412_s20 + $0x18] sm:$0xff]  ;;  %s3947_s18 = scalar_lea.vmem %s3946_s22, %s3384_s0 }
  0xe5   : > { %1291 = vmatpush.bf16.msrb.mxu1 %v2925_v63 }
  0xe6   : > { %v934_v28 = vmul.f32 %v3041_v25, %v933_v27 }
  0xe7   : > { %1107 = vmatpush.bf16.msrb.mxu2 %v2922_v56 }
  0xe8   : > { %v935_v29 = vadd.f32 %v3041_v25, %v934_v28 }
  0xe9   : > { %1292 = vmatpush.bf16.msrb.mxu1 %v2924_v2 }
  0xea   : > { %v3474_v30 = vsel %vm936_vm3, %v3041_v25, %v935_v29  ;;  %v2926_v25 = vld [vmem:[%s3412_s20 + $0x10] sm:$0xff] }
 0x14f   : > { %v930_v31 = vpop.xlane.xlu0 %929 }
 0x150   : > { %v940_v32 = vmul.f32 %v3474_v30, %v930_v31 }
 0x152   : > { %v3477_v33 = vsub.f32 %v918_v18, %v940_v32 }
 0x154   : > { %v946_v34 = vmul.f32 %v3477_v33, %v3477_v33 }
 0x155   : > { %v927_v35 = vpop.xlane.xlu1 %926 }
 0x156   : > { %v953_v36 = vsel %vm921_vm2, %v946_v34, 0.0  ;;  %v939_v39 = vmul.f32 %v3474_v30, %v927_v35 }
 0x157   : > { %954 = vadd.xlane.f32.xlu1 %v953_v36  ;;  %v924_v37 = vpop.xlane.xlu0 %923 }
 0x158   : > { %v938_v38 = vmul.f32 %v3474_v30, %v924_v37  ;;  %v3486_v41 = vsub.f32 %v917_v19, %v939_v39 }
 0x15a   : > { %v3484_v40 = vsub.f32 %v916_v22, %v938_v38  ;;  %v945_v44 = vmul.f32 %v3486_v41, %v3486_v41 }
 0x15c   : > { %v944_v42 = vmul.f32 %v3484_v40, %v3484_v40  ;;  %v950_v45 = vsel %vm921_vm2, %v945_v44, 0.0 }
 0x15e   : > { %v947_v43 = vsel %vm921_vm2, %v944_v42, 0.0 }
 0x15f   : > { %948 = vadd.xlane.f32.xlu2 %v947_v43 }
 0x167   : > { %951 = vadd.xlane.f32.xlu2 %v950_v45 }
 0x1ca   : > { %v955_v50 = vpop.xlane.xlu1 %954 }
 0x1cb   : > { %v958_v51 = vmul.f32 %v955_v50, %v3474_v30 }
 0x1cd   : > { %v961_v52 = vadd.f32 1e-05, %v958_v51 }
 0x1cf   : > { %3042 = vrsqrt.f32 %v961_v52  ;;  %vm988_vm5 = vweird.f32 %v961_v52 }
 0x1d2   : > { %v949_v54 = vpop.xlane.xlu2 %948 }
 0x1d3   : > { %v956_v55 = vmul.f32 %v949_v54, %v3474_v30 }
 0x1d5   : > { %v3043_v57 = vpop.eup %3042  ;;  %v959_v58 = vadd.f32 1e-05, %v956_v55 }
 0x1d6   : > { %v983_v59 = vmul.f32 %v3043_v57, %v961_v52  ;;  %vm989_vm4 = vweird.f32 %v3043_v57 }
 0x1d7   : > { %3044 = vrsqrt.f32 %v959_v58  ;;  %vm990_vm6 = vmor %vm988_vm5, %vm989_vm4  ;;  %vm968_vm8 = vweird.f32 %v959_v58 }
 0x1d8   : > { %v984_v60 = vmul.f32 %v3043_v57, %v983_v59 }
 0x1da   : > { %v985_v61 = vmul.f32 0.5, %v984_v60  ;;  %v952_v62 = vpop.xlane.xlu2 %951 }
 0x1db   : > { %v957_v0 = vmul.f32 %v952_v62, %v3474_v30  ;;  %v2928_v62 = vld [vmem:[%s3417_s27 + $0x10] sm:$0xff] }
 0x1dc   : > { %v986_v1 = vsub.f32 1.5, %v985_v61 }
 0x1dd   : > { %v3045_v3 = vpop.eup %3044  ;;  %v960_v4 = vadd.f32 1e-05, %v957_v0 }
 0x1de   : > { %v987_v5 = vmul.f32 %v3043_v57, %v986_v1  ;;  %v963_v6 = vmul.f32 %v3045_v3, %v959_v58  ;;  %vm969_vm7 = vweird.f32 %v3045_v3  ;;  %v2929_v58 = vld [vmem:[%s3417_s27 + $0x18] sm:$0xff] }
 0x1df   : > { %3046 = vrsqrt.f32 %v960_v4  ;;  %vm970_vm9 = vmor %vm968_vm8, %vm969_vm7  ;;  %vm978_vm11 = vweird.f32 %v960_v4 }
 0x1e0   : > { %v991_v8 = vsel %vm990_vm6, %v3043_v57, %v987_v5  ;;  %v964_v9 = vmul.f32 %v3045_v3, %v963_v6 }
 0x1e1   : > { %v994_v11 = vmul.f32 %v991_v8, %v3477_v33 }
 0x1e2   : > { %v965_v12 = vmul.f32 0.5, %v964_v9 }
 0x1e3   : > { %v1000_v13 = vmul.f32 %v3032_v7, %v994_v11 }
 0x1e4   : > { %v966_v14 = vsub.f32 1.5, %v965_v12 }
 0x1e5   : > { %v3047_v15 = vpop.eup %3046  ;;  %v1006_v16 = vadd.f32 %v3033_v10, %v1000_v13 }
 0x1e6   : > { %v967_v17 = vmul.f32 %v3045_v3, %v966_v14  ;;  %v973_v18 = vmul.f32 %v3047_v15, %v960_v4  ;;  %vm979_vm10 = vweird.f32 %v3047_v15 }
 0x1e7   : > { %v3516_v19 = vpack.c.bf16 %v1006_v16, %v1006_v16  ;;  %vm980_vm12 = vmor %vm978_vm11, %vm979_vm10 }
 0x1e8   : > { %v974_v20 = vmul.f32 %v3047_v15, %v973_v18  ;;  %v971_v21 = vsel %vm970_vm9, %v3045_v3, %v967_v17 }
 0x1e9   : > { %2690 = vmatmul.msk.bf16.vlgmr.msra.gmra.mxu2 %vm921_vm2, %v3516_v19  ;;  %2700 = vmatmul.msk.bf16.vlgmr.msra.gmra.mxu3 %vm921_vm2, %v3516_v19  ;;  %v992_v26 = vmul.f32 %v971_v21, %v3484_v40 }
 0x1ea   : > { %v975_v22 = vmul.f32 0.5, %v974_v20  ;;  %1326 = vmatpush.bf16.msra.mxu2 %v2927_v23 }
 0x1eb   : > { %v998_v29 = vmul.f32 %v3032_v7, %v992_v26 }
 0x1ec   : > { %v976_v24 = vsub.f32 1.5, %v975_v22 }
 0x1ed   : > { %v1004_v33 = vadd.f32 %v3033_v10, %v998_v29 }
 0x1ee   : > { %v977_v27 = vmul.f32 %v3047_v15, %v976_v24  ;;  %1327 = vmatpush.bf16.msra.mxu2 %v2926_v25 }
 0x1f0   : > { %v981_v28 = vsel %vm980_vm12, %v3047_v15, %v977_v27 }
 0x1f1   : > { %v993_v31 = vmul.f32 %v981_v28, %v3486_v41 }
 0x1f3   : > { %v999_v32 = vmul.f32 %v3032_v7, %v993_v31 }
 0x1f5   : > { %v1005_v34 = vadd.f32 %v3033_v10, %v999_v32 }
 0x1f7   : > { %v3526_v35 = vpack.c.bf16 %v1005_v34, %v1004_v33 }
 0x1f9   : > { %2689 = vmatmul.msk.bf16.vlgmr.msra.gmra.mxu0 %vm921_vm2, %v3526_v35  ;;  %2699 = vmatmul.msk.bf16.vlgmr.msra.gmra.mxu1 %vm921_vm2, %v3526_v35 }
 0x1fa   : > { %2709 = vmatmul.msk.bf16.vlgmr.msrb.gmra.mxu2 %vm921_vm2, %v3526_v35 }
 0x209   : > { %2727 = vmatmul.msk.bf16.vlgmr.msrb.gmra.mxu1 %vm921_vm2, %v3526_v35 }
 0x20a   : > { %2710 = vmatmul.msk.bf16.gmra.mxu2 %vm921_vm2, %v3516_v19 }
 0x219   : > { %2728 = vmatmul.msk.bf16.gmra.mxu1 %vm921_vm2, %v3516_v19 }
 0x21a   : > { %2741 = vmatmul.msk.bf16.vlgmr.msra.gmra.mxu2 %vm921_vm2, %v3526_v35 }
 0x22a   : > { %2742 = vmatmul.msk.bf16.gmra.mxu2 %vm921_vm2, %v3516_v19 }
 0x26c   : > { %v1046_v36 = vpop.f32.mrf.mxu2  ;;  %v1080_v37 = vpop.f32.mrf.mxu3 }
 0x26d   : > { %v1123_v38 = vpack.c.bf16 %v1080_v37, %v1080_v37  ;;  %v1120_v11 = vpack.c.bf16 %v1046_v36, %v1046_v36 }
 0x26f   : > { %v1140_v39 = vunpack.c.l.b16 %v1123_v38  ;;  %v1132_v18 = vunpack.c.l.b16 %v1120_v11 }
 0x271   : > { %v1142_v40 = vpack.c.b16 %v1140_v39, %v1140_v39  ;;  %v1134_v21 = vpack.c.b16 %v1132_v18, %v1132_v18  ;;  %v3568_v39 = vld [vmem:[%s3943_s16] ss:$0 sm:$0xff] }
 0x273   : > { %v1154_v41 = vsel %vm1143_vm13, %v1142_v40, 0 }
 0x274   : > { %v1048_v42 = vpop.f32.mrf.mxu2  ;;  %v1082_v43 = vpop.f32.mrf.mxu3  ;;  %1162 = vmatpush.bf16.xpose.msrb.mxu3 %v1154_v41 }
 0x276   : > { %v1041_v44 = vpop.f32.mrf.mxu0  ;;  %v1075_v45 = vpop.f32.mrf.mxu1 }
 0x277   : > { %v1121_v46 = vpack.c.bf16 %v1075_v45, %v1075_v45  ;;  %v1118_v55 = vpack.c.bf16 %v1041_v44, %v1041_v44 }
 0x279   : > { %v1138_v51 = vunpack.c.l.b16 %v1121_v46  ;;  %v1130_v61 = vunpack.c.l.b16 %v1118_v55 }
 0x27d   : > { %v1109_v47 = vpop.f32.mrf.mxu2 }
 0x27e   : > { %v1077_v48 = vpop.f32.mrf.mxu1  ;;  %v1043_v50 = vpop.f32.mrf.mxu0  ;;  %v1124_v7 = vpack.c.bf16 %v1109_v47, %v1109_v47 }
 0x27f   : > { %v1122_v49 = vpack.c.bf16 %v1077_v48, %v1077_v48  ;;  %v1119_v53 = vpack.c.bf16 %v1043_v50, %v1043_v50 }
 0x280   : > { %v1231_v15 = vunpack.c.l.b16 %v1124_v7 }
 0x281   : > { %v1139_v52 = vunpack.c.l.b16 %v1122_v49  ;;  %v1131_v60 = vunpack.c.l.b16 %v1119_v53 }
 0x283   : > { %v1141_v54 = vpack.c.b16 %v1139_v52, %v1138_v51  ;;  %v1133_v63 = vpack.c.b16 %v1131_v60, %v1130_v61 }
 0x285   : > { %v1111_v56 = vpop.f32.mrf.mxu2  ;;  %v1151_v57 = vsel %vm1143_vm13, %v1141_v54, 0 }
 0x286   : > { %1163 = vmatpush.bf16.xpose.msrb.mxu3 %v1151_v57  ;;  %v1294_v59 = vpop.f32.mrf.mxu1  ;;  %v1125_v4 = vpack.c.bf16 %v1111_v56, %v1111_v56 }
 0x287   : > { %v1373_v0 = vpack.c.bf16 %v1294_v59, %v1294_v59 }
 0x288   : > { %v1232_v12 = vunpack.c.l.b16 %v1125_v4 }
 0x289   : > { %v3549_v8 = vunpack.c.l.b16 %v1373_v0 }
 0x28a   : > { %v1234_v20 = vpack.c.b16 %v1232_v12, %v1231_v15 }
 0x28d   : > { %v1114_v1 = vpop.f32.mrf.mxu2  ;;  %2711 = vmatmul.msk.bf16.vlgmr.msrb.gmra.mxu3 %vm1143_vm13, %v1133_v63 }
 0x28e   : > { %1361 = vmatpush.bf16.msra.mxu3 %v2929_v58  ;;  %v1126_v2 = vpack.c.bf16 %v1114_v1, %v1114_v1  ;;  %v1296_v3 = vpop.f32.mrf.mxu1 }
 0x28f   : > { %v1374_v5 = vpack.c.bf16 %v1296_v3, %v1296_v3 }
 0x290   : > { %v1233_v6 = vunpack.c.l.b16 %v1126_v2 }
 0x291   : > { %v3551_v9 = vunpack.c.l.b16 %v1374_v5 }
 0x292   : > { %1362 = vmatpush.bf16.msra.mxu3 %v2928_v62  ;;  %v1235_v10 = vpack.c.b16 %v1233_v6, %v1233_v6 }
 0x293   : > { %v1388_v13 = vpack.c.b16 %v3551_v9, %v3549_v8 }
 0x294   : > { %v1245_v14 = vsel %vm1243_vm14, %v1235_v10, 0 }
 0x295   : > { %v1116_v16 = vpop.f32.mrf.mxu2  ;;  %1253 = vmatpush.bf16.msrb.mxu0 %v1245_v14 }
 0x296   : > { %v3556_v17 = vpop.f32.mrf.mxu1 }
 0x299   : > { %1254 = vmatpush.bf16.msrb.mxu0 %v1234_v20 }
 0x29d   : > { %v1329_v22 = vpop.f32.mrf.mxu2  ;;  %2712 = vmatmul.msk.bf16.gmra.mxu3 %vm1143_vm13, %v1134_v21 }
 0x29e   : > { %v1301_v23 = vpop.f32.mrf.mxu1  ;;  %v1376_v29 = vpack.c.bf16 %v1329_v22, %v1329_v22 }
 0x2a0   : > { %v1393_v36 = vunpack.c.l.b16 %v1376_v29 }
 0x2a5   : > { %v1331_v24 = vpop.f32.mrf.mxu2 }
 0x2a6   : > { %v1377_v27 = vpack.c.bf16 %v1331_v24, %v1331_v24 }
 0x2a8   : > { %v1394_v32 = vunpack.c.l.b16 %v1377_v27 }
 0x2aa   : > { %v1396_v37 = vpack.c.b16 %v1394_v32, %v1393_v36 }
 0x2ac   : > { %v1405_v38 = vsel %vm1143_vm13, %v1396_v37, 0 }
 0x2ad   : > { %v1334_v25 = vpop.f32.mrf.mxu2  ;;  %2755 = vmatmul.msk.bf16.vlgmr.msra.gmra.mxu3 %vm921_vm2, %v3526_v35 }
 0x2ae   : > { %v1378_v26 = vpack.c.bf16 %v1334_v25, %v1334_v25 }
 0x2b0   : > { %v1395_v28 = vunpack.c.l.b16 %v1378_v26 }
 0x2b2   : > { %v1397_v31 = vpack.c.b16 %v1395_v28, %v1395_v28 }
 0x2b4   : > { %v1408_v33 = vsel %vm1143_vm13, %v1397_v31, 0 }
 0x2b5   : > { %v1336_v34 = vpop.f32.mrf.mxu2  ;;  %1416 = vmatpush.bf16.xpose.msra.mxu0 %v1408_v33 }
 0x2bd   : > { %1417 = vmatpush.bf16.xpose.msra.mxu0 %v1405_v38  ;;  %2756 = vmatmul.msk.bf16.gmra.mxu3 %vm921_vm2, %v3516_v19 }
 0x310   : > { %v1165_v40 = vpop.f32.mrf.mxu3 }
 0x311   : > { %v1174_v41 = vmul.f32 0.35355338, %v1165_v40 }
 0x313   : > { %v1180_v42 = vadd.f32 %v3568_v39, %v1174_v41 }
 0x315   : > { %v1184_v43 = vsel %vm1183_vm15, %v1180_v42, -inf }
 0x316   : > { %1185 = vmax.xlane.f32.xlu0 %v1184_v43  ;;  %v2930_v43 = vld [vmem:[%s3407_s24 + $0x20] sm:$0xff] }
 0x318   : > { %v1167_v44 = vpop.f32.mrf.mxu3 }
 0x319   : > { %v1175_v45 = vmul.f32 0.35355338, %v1167_v44  ;;  %v1375_v44 = vpack.c.bf16 %v3556_v17, %v3556_v17 }
 0x31b   : > { %v1181_v46 = vadd.f32 %v3568_v39, %v1175_v45  ;;  %v1387_v45 = vunpack.c.l.b16 %v1375_v44 }
 0x31d   : > { %v1187_v47 = vsel %vm1183_vm15, %v1181_v46, -inf }
 0x31e   : > { %1188 = vmax.xlane.f32.xlu1 %v1187_v47  ;;  %v1267_v47 = vld [vmem:[%s3944_s23] sm:$0xf] }
 0x320   : > { %v1170_v48 = vpop.f32.mrf.mxu3 }
 0x321   : > { %v1176_v49 = vmul.f32 0.35355338, %v1170_v48  ;;  %v1552_v48 = vsel %vm1243_vm14, %v1267_v47, 0 }
 0x322   : > { %1561 = vmatpush.bf16.msrb.mxu3 %v1552_v48 }
 0x323   : > { %v1182_v50 = vadd.f32 %v3568_v39, %v1176_v49 }
 0x325   : > { %v1190_v51 = vsel %vm1183_vm15, %v1182_v50, -inf }
 0x326   : > { %1191 = vmax.xlane.f32.xlu2 %v1190_v51 }
 0x328   : > { %v1172_v52 = vpop.f32.mrf.mxu3 }
 0x330   : > { %v1364_v53 = vpop.f32.mrf.mxu3 }
 0x331   : > { %v1379_v59 = vpack.c.bf16 %v1364_v53, %v1364_v53 }
 0x333   : > { %v1481_v63 = vunpack.c.l.b16 %v1379_v59 }
 0x338   : > { %v1366_v54 = vpop.f32.mrf.mxu3 }
 0x339   : > { %v1380_v57 = vpack.c.bf16 %v1366_v54, %v1366_v54 }
 0x33b   : > { %v1482_v61 = vunpack.c.l.b16 %v1380_v57 }
 0x33d   : > { %v1484_v1 = vpack.c.b16 %v1482_v61, %v1481_v63 }
 0x340   : > { %v1369_v55 = vpop.f32.mrf.mxu3 }
 0x341   : > { %v1381_v56 = vpack.c.bf16 %v1369_v55, %v1369_v55 }
 0x343   : > { %v1483_v58 = vunpack.c.l.b16 %v1381_v56 }
 0x345   : > { %v1485_v60 = vpack.c.b16 %v1483_v58, %v1483_v58 }
 0x347   : > { %v1494_v62 = vsel %vm1243_vm14, %v1485_v60, 0 }
 0x348   : > { %v1371_v0 = vpop.f32.mrf.mxu3  ;;  %1502 = vmatpush.bf16.msra.mxu1 %v1494_v62 }
 0x34c   : > { %1503 = vmatpush.bf16.msra.mxu1 %v1484_v1 }
 0x389   : > { %v1186_v2 = vpop.xlane.xlu0 %1185 }
 0x38a   : > { %v1193_v3 = vsub.f32 %v1180_v42, %v1186_v2  ;;  %v2931_v42 = vld [vmem:[%s3407_s24 + $0x28] sm:$0xff] }
 0x38c   : > { %v1196_v4 = vmul.f32 1.442695, %v1193_v3 }
 0x38e   : > { %3048 = vpow2.f32 %v1196_v4 }
 0x391   : > { %v1189_v5 = vpop.xlane.xlu1 %1188 }
 0x392   : > { %v1194_v6 = vsub.f32 %v1181_v46, %v1189_v5  ;;  %v1389_v46 = vpack.c.b16 %v1387_v45, %v1387_v45 }
 0x394   : > { %v3049_v7 = vpop.eup %3048  ;;  %v1198_v10 = vmul.f32 1.442695, %v1194_v6 }
 0x395   : > { %v1202_v11 = vsel %vm1183_vm15, %v3049_v7, 0.0 }
 0x396   : > { %3050 = vpow2.f32 %v1198_v10  ;;  %1203 = vadd.xlane.f32.xlu0 %v1202_v11 }
 0x399   : > { %v1192_v12 = vpop.xlane.xlu2 %1191 }
 0x39a   : > { %v1195_v14 = vsub.f32 %v1182_v50, %v1192_v12 }
 0x39c   : > { %v3051_v15 = vpop.eup %3050  ;;  %v1200_v16 = vmul.f32 1.442695, %v1195_v14 }
 0x39d   : > { %v1205_v18 = vsel %vm1183_vm15, %v3051_v15, 0.0 }
 0x39e   : > { %3052 = vpow2.f32 %v1200_v16  ;;  %1206 = vadd.xlane.f32.xlu1 %v1205_v18 }
 0x3a4   : > { %v3053_v20 = vpop.eup %3052 }
 0x3a5   : > { %v1208_v21 = vsel %vm1183_vm15, %v3053_v20, 0.0 }
 0x3a6   : > { %1209 = vadd.xlane.f32.xlu2 %v1208_v21 }
 0x409   : > { %v1204_v22 = vpop.xlane.xlu0 %1203 }
 0x40a   : > { %3054 = vrcp.f32 %v1204_v22 }
 0x410   : > { %v3055_v24 = vpop.eup %3054 }
 0x411   : > { %v1207_v23 = vpop.xlane.xlu1 %1206  ;;  %v1214_v25 = vmul.f32 %v3055_v24, %v3049_v7 }
 0x412   : > { %3056 = vrcp.f32 %v1207_v23 }
 0x413   : > { %v1217_v27 = vpack.c.bf16 %v1214_v25, %v1214_v25 }
 0x415   : > { %v1223_v32 = vunpack.c.l.b16 %v1217_v27 }
 0x418   : > { %v3057_v26 = vpop.eup %3056 }
 0x419   : > { %v1215_v28 = vmul.f32 %v3057_v26, %v3051_v15  ;;  %v1210_v29 = vpop.xlane.xlu2 %1209 }
 0x41a   : > { %3058 = vrcp.f32 %v1210_v29 }
 0x41b   : > { %v1218_v31 = vpack.c.bf16 %v1215_v28, %v1215_v28 }
 0x41d   : > { %v1224_v33 = vunpack.c.l.b16 %v1218_v31 }
 0x41f   : > { %v1226_v34 = vpack.c.b16 %v1224_v33, %v1223_v32 }
 0x420   : > { %v3059_v36 = vpop.eup %3058 }
 0x421   : > { %2713 = vmatmul.msk.bf16.vlgmr.msrb.gmra.mxu0 %vm1183_vm15, %v1226_v34  ;;  %v1216_v37 = vmul.f32 %v3059_v36, %v3053_v20 }
 0x422   : > { %1595 = vmatpush.bf16.msrb.mxu0 %v2931_v42 }
 0x423   : > { %v1219_v38 = vpack.c.bf16 %v1216_v37, %v1216_v37  ;;  %v2933_v37 = vld [vmem:[%s3412_s20 + $0x28] sm:$0xff] }
 0x424   : > { %1630 = vmatpush.bf16.msrb.mxu1 %v2933_v37 }
 0x425   : > { %v1225_v40 = vunpack.c.l.b16 %v1219_v38 }
 0x426   : > { %1596 = vmatpush.bf16.msrb.mxu0 %v2930_v43 }
 0x427   : > { %v1227_v41 = vpack.c.b16 %v1225_v40, %v1225_v40  ;;  %v2932_v40 = vld [vmem:[%s3412_s20 + $0x20] sm:$0xff] }
 0x428   : > { %1631 = vmatpush.bf16.msrb.mxu1 %v2932_v40 }
 0x431   : > { %2714 = vmatmul.msk.bf16.gmra.mxu0 %vm1183_vm15, %v1227_v41 }
 0x441   : > { %2757 = vmatmul.msk.bf16.vlgmr.msra.gmra.mxu0 %vm1143_vm13, %v1388_v13 }
 0x451   : > { %2758 = vmatmul.msk.bf16.gmra.mxu0 %vm1143_vm13, %v1389_v46 }
 0x461   : > { %2778 = vmatmul.msk.bf16.vlgmr.msrb.gmra.mxu0 %vm921_vm2, %v3526_v35 }
 0x471   : > { %2779 = vmatmul.msk.bf16.gmra.mxu0 %vm921_vm2, %v3516_v19 }
 0x49e   : > { %v1256_v8 = vpop.f32.mrf.mxu0 }
 0x4a6   : > { %v1258_v9 = vpop.f32.mrf.mxu0 }
 0x4a7   : > { %v1265_v13 = vpack.c.bf16 %v1258_v9, %v1256_v8 }
 0x4a9   : > { %2764 = vmatmul.msk.bf16.vlgmr.msrb.gmra.mxu3 %vm1143_vm13, %v1265_v13 }
 0x4ae   : > { %v1261_v17 = vpop.f32.mrf.mxu0 }
 0x4af   : > { %v1266_v50 = vpack.c.bf16 %v1261_v17, %v1261_v17 }
 0x4b6   : > { %v1263_v49 = vpop.f32.mrf.mxu0 }
 0x4b9   : > { %2765 = vmatmul.msk.bf16.gmra.mxu3 %vm1143_vm13, %v1266_v50 }
 0x4be   : > { %v1419_v51 = vpop.f32.mrf.mxu0 }
 0x4bf   : > { %v1428_v52 = vmul.f32 0.35355338, %v1419_v51  ;;  %v2761_v51 = vld [vmem:[%s3944_s23 + $0x4] sm:$0xf] }
 0x4c1   : > { %v1431_v53 = vadd.f32 %v3568_v39, %v1428_v52  ;;  %v1525_v52 = vsel %vm1243_vm14, %v2761_v51, 0 }
 0x4c2   : > { %1534 = vmatpush.bf16.msrb.mxu2 %v1525_v52 }
 0x4c3   : > { %v1434_v54 = vsel %vm1183_vm15, %v1431_v53, -inf }
 0x4c4   : > { %1435 = vmax.xlane.f32.xlu0 %v1434_v54  ;;  %v2935_v54 = vld [vmem:[%s3417_s27 + $0x28] sm:$0xff] }
 0x4c6   : > { %v1421_v55 = vpop.f32.mrf.mxu0  ;;  %1665 = vmatpush.bf16.msra.mxu2 %v2935_v54 }
 0x4c7   : > { %v1429_v56 = vmul.f32 0.35355338, %v1421_v55  ;;  %v2934_v55 = vld [vmem:[%s3417_s27 + $0x20] sm:$0xff] }
 0x4c9   : > { %v1432_v57 = vadd.f32 %v3568_v39, %v1429_v56 }
 0x4ca   : > { %1666 = vmatpush.bf16.msra.mxu2 %v2934_v55 }
 0x4cb   : > { %v1437_v58 = vsel %vm1183_vm15, %v1432_v57, -inf }
 0x4cc   : > { %1438 = vmax.xlane.f32.xlu1 %v1437_v58 }
 0x4ce   : > { %v1424_v59 = vpop.f32.mrf.mxu0 }
 0x4cf   : > { %v1430_v60 = vmul.f32 0.35355338, %v1424_v59 }
 0x4d1   : > { %v1433_v61 = vadd.f32 %v3568_v39, %v1430_v60 }
 0x4d3   : > { %v1440_v62 = vsel %vm1183_vm15, %v1433_v61, -inf }
 0x4d4   : > { %1441 = vmax.xlane.f32.xlu2 %v1440_v62  ;;  %v2937_v62 = vld [vmem:[%s3407_s24 + $0x38] sm:$0xff] }
 0x4d6   : > { %v1426_v63 = vpop.f32.mrf.mxu0 }
 0x4d7   : > { %v2936_v63 = vld [vmem:[%s3407_s24 + $0x30] sm:$0xff] }
 0x4de   : > { %v1598_v0 = vpop.f32.mrf.mxu0 }
 0x4df   : > { %v1677_v1 = vpack.c.bf16 %v1598_v0, %v1598_v0 }
 0x4e1   : > { %v3605_v4 = vunpack.c.l.b16 %v1677_v1 }
 0x4e6   : > { %v1600_v2 = vpop.f32.mrf.mxu0 }
 0x4e7   : > { %v1678_v3 = vpack.c.bf16 %v1600_v2, %v1600_v2 }
 0x4e9   : > { %v3607_v5 = vunpack.c.l.b16 %v1678_v3 }
 0x4eb   : > { %v1692_v6 = vpack.c.b16 %v3607_v5, %v3605_v4 }
 0x4ee   : > { %v3611_v7 = vpop.f32.mrf.mxu0 }
 0x4f6   : > { %v1605_v10 = vpop.f32.mrf.mxu0 }
 0x52c   : > { %v3613_v11 = vpop.f32.mrf.mxu3 }
 0x534   : > { %v3615_v12 = vpop.f32.mrf.mxu3 }
 0x537   : > { %v1436_v14 = vpop.xlane.xlu0 %1435 }
 0x538   : > { %v1443_v15 = vsub.f32 %v1431_v53, %v1436_v14 }
 0x53a   : > { %v1446_v16 = vmul.f32 1.442695, %v1443_v15 }
 0x53c   : > { %3060 = vpow2.f32 %v1446_v16  ;;  %v3617_v18 = vpop.f32.mrf.mxu3 }
 0x53f   : > { %v1439_v20 = vpop.xlane.xlu1 %1438 }
 0x540   : > { %v1444_v21 = vsub.f32 %v1432_v57, %v1439_v20 }
 0x542   : > { %v3061_v22 = vpop.eup %3060  ;;  %v1448_v23 = vmul.f32 1.442695, %v1444_v21 }
 0x543   : > { %v1452_v24 = vsel %vm1183_vm15, %v3061_v22, 0.0 }
 0x544   : > { %3062 = vpow2.f32 %v1448_v23  ;;  %1453 = vadd.xlane.f32.xlu0 %v1452_v24  ;;  %v1570_v25 = vpop.f32.mrf.mxu3  ;;  %v2939_v24 = vld [vmem:[%s3412_s20 + $0x38] sm:$0xff] }
 0x547   : > { %v1442_v26 = vpop.xlane.xlu2 %1441 }
 0x548   : > { %v1445_v27 = vsub.f32 %v1433_v61, %v1442_v26  ;;  %v2938_v26 = vld [vmem:[%s3412_s20 + $0x30] sm:$0xff] }
 0x54a   : > { %v3063_v28 = vpop.eup %3062  ;;  %v1450_v29 = vmul.f32 1.442695, %v1445_v27  ;;  %v1679_v27 = vpack.c.bf16 %v3611_v7, %v3611_v7 }
 0x54b   : > { %v1455_v31 = vsel %vm1183_vm15, %v3063_v28, 0.0 }
 0x54c   : > { %3064 = vpow2.f32 %v1450_v29  ;;  %1456 = vadd.xlane.f32.xlu1 %v1455_v31 }
 0x552   : > { %v3065_v32 = vpop.eup %3064 }
 0x553   : > { %v1458_v33 = vsel %vm1183_vm15, %v3065_v32, 0.0 }
 0x554   : > { %1459 = vadd.xlane.f32.xlu2 %v1458_v33 }
 0x5b7   : > { %v1454_v34 = vpop.xlane.xlu0 %1453 }
 0x5b8   : > { %3066 = vrcp.f32 %v1454_v34 }
 0x5be   : > { %v3067_v38 = vpop.eup %3066 }
 0x5bf   : > { %v1457_v36 = vpop.xlane.xlu1 %1456  ;;  %v1464_v41 = vmul.f32 %v3067_v38, %v3061_v22 }
 0x5c0   : > { %3068 = vrcp.f32 %v1457_v36 }
 0x5c1   : > { %v1467_v43 = vpack.c.bf16 %v1464_v41, %v1464_v41 }
 0x5c3   : > { %v1473_v47 = vunpack.c.l.b16 %v1467_v43 }
 0x5c6   : > { %v3069_v42 = vpop.eup %3068 }
 0x5c7   : > { %v1465_v44 = vmul.f32 %v3069_v42, %v3063_v28  ;;  %v1460_v45 = vpop.xlane.xlu2 %1459  ;;  %v1691_v28 = vunpack.c.l.b16 %v1679_v27 }
 0x5c8   : > { %3070 = vrcp.f32 %v1460_v45 }
 0x5c9   : > { %v1468_v46 = vpack.c.bf16 %v1465_v44, %v1465_v44  ;;  %v1693_v29 = vpack.c.b16 %v1691_v28, %v1691_v28 }
 0x5cb   : > { %v1474_v48 = vunpack.c.l.b16 %v1468_v46 }
 0x5cd   : > { %v1476_v8 = vpack.c.b16 %v1474_v48, %v1473_v47 }
 0x5ce   : > { %v3071_v9 = vpop.eup %3070 }
 0x5cf   : > { %2759 = vmatmul.msk.bf16.vlgmr.msra.gmra.mxu1 %vm1183_vm15, %v1476_v8  ;;  %v1466_v13 = vmul.f32 %v3071_v9, %v3065_v32 }
 0x5d1   : > { %v1469_v17 = vpack.c.bf16 %v1466_v13, %v1466_v13 }
 0x5d3   : > { %v1475_v49 = vunpack.c.l.b16 %v1469_v17 }
 0x5d5   : > { %v1477_v50 = vpack.c.b16 %v1475_v49, %v1475_v49 }
 0x5df   : > { %2760 = vmatmul.msk.bf16.gmra.mxu1 %vm1183_vm15, %v1477_v50 }
 0x5ef   : > { %2792 = vmatmul.msk.bf16.vlgmr.msrb.gmra.mxu1 %vm921_vm2, %v3526_v35 }
 0x5ff   : > { %2793 = vmatmul.msk.bf16.gmra.mxu1 %vm921_vm2, %v3516_v19 }
 0x64c   : > { %v1505_v53 = vpop.f32.mrf.mxu1 }
 0x654   : > { %v1507_v56 = vpop.f32.mrf.mxu1 }
 0x655   : > { %v1514_v57 = vpack.c.bf16 %v1507_v56, %v1505_v53 }
 0x657   : > { %2762 = vmatmul.msk.bf16.vlgmr.msrb.gmra.mxu2 %vm1143_vm13, %v1514_v57 }
 0x658   : > { %1875 = vmatpush.bf16.msrb.mxu2 %v2937_v62  ;;  %v2812_v62 = vld [vmem:[%s3944_s23 + $0x8] sm:$0xf] }
 0x65c   : > { %v1510_v58 = vpop.f32.mrf.mxu1  ;;  %1876 = vmatpush.bf16.msrb.mxu2 %v2936_v63  ;;  %v1829_v63 = vsel %vm1243_vm14, %v2812_v62, 0 }
 0x65d   : > { %v1515_v60 = vpack.c.bf16 %v1510_v58, %v1510_v58  ;;  %1838 = vmatpush.bf16.msra.mxu1 %v1829_v63 }
 0x664   : > { %v1512_v59 = vpop.f32.mrf.mxu1 }
 0x667   : > { %2763 = vmatmul.msk.bf16.gmra.mxu2 %vm1143_vm13, %v1515_v60 }
 0x66c   : > { %v1633_v61 = vpop.f32.mrf.mxu1 }
 0x66d   : > { %v1680_v14 = vpack.c.bf16 %v1633_v61, %v1633_v61 }
 0x66f   : > { %v1697_v22 = vunpack.c.l.b16 %v1680_v14 }
 0x674   : > { %v1635_v0 = vpop.f32.mrf.mxu1 }
 0x675   : > { %v1681_v3 = vpack.c.bf16 %v1635_v0, %v1635_v0 }
 0x677   : > { %2806 = vmatmul.msk.bf16.vlgmr.msra.gmra.mxu2 %vm921_vm2, %v3526_v35  ;;  %v1698_v16 = vunpack.c.l.b16 %v1681_v3 }
 0x679   : > { %v1700_v23 = vpack.c.b16 %v1698_v16, %v1697_v22 }
 0x67b   : > { %v1709_v25 = vsel %vm1143_vm13, %v1700_v23, 0 }
 0x67c   : > { %v1638_v1 = vpop.f32.mrf.mxu1 }
 0x67d   : > { %v1682_v2 = vpack.c.bf16 %v1638_v1, %v1638_v1 }
 0x67f   : > { %v1699_v10 = vunpack.c.l.b16 %v1682_v2 }
 0x681   : > { %v1701_v15 = vpack.c.b16 %v1699_v10, %v1699_v10 }
 0x683   : > { %v1712_v20 = vsel %vm1143_vm13, %v1701_v15, 0 }
 0x684   : > { %v1640_v21 = vpop.f32.mrf.mxu1  ;;  %1720 = vmatpush.bf16.xpose.msra.mxu3 %v1712_v20 }
 0x687   : > { %2807 = vmatmul.msk.bf16.gmra.mxu2 %vm921_vm2, %v3516_v19 }
 0x68c   : > { %1721 = vmatpush.bf16.xpose.msra.mxu3 %v1709_v25 }
 0x693   : > { %2808 = vmatmul.msk.bf16.vlgmr.msra.gmra.mxu3 %vm1143_vm13, %v1692_v6 }
 0x694   : > { %1910 = vmatpush.bf16.msrb.mxu3 %v2939_v24 }
 0x697   : > { %2827 = vmatmul.msk.bf16.vlgmr.msrb.gmra.mxu2 %vm921_vm2, %v3526_v35 }
 0x698   : > { %1911 = vmatpush.bf16.msrb.mxu3 %v2938_v26 }
 0x6a3   : > { %2809 = vmatmul.msk.bf16.gmra.mxu3 %vm1143_vm13, %v1693_v29 }
 0x6a7   : > { %2828 = vmatmul.msk.bf16.gmra.mxu2 %vm921_vm2, %v3516_v19 }
 0x6b3   : > { %2841 = vmatmul.msk.bf16.vlgmr.msrb.gmra.mxu3 %vm921_vm2, %v3526_v35 }
 0x6c3   : > { %2842 = vmatmul.msk.bf16.gmra.mxu3 %vm921_vm2, %v3516_v19 }
 0x6da   : > { %v3661_v4 = vpop.f32.mrf.mxu2 }
 0x6e2   : > { %v3663_v5 = vpop.f32.mrf.mxu2 }
 0x6ea   : > { %v3665_v6 = vpop.f32.mrf.mxu2 }
 0x6f2   : > { %v1543_v7 = vpop.f32.mrf.mxu2 }
 0x6fa   : > { %v1668_v31 = vpop.f32.mrf.mxu2 }
 0x6fb   : > { %v1683_v38 = vpack.c.bf16 %v1668_v31, %v1668_v31 }
 0x6fd   : > { %v1785_v43 = vunpack.c.l.b16 %v1683_v38 }
 0x702   : > { %v1670_v32 = vpop.f32.mrf.mxu2 }
 0x703   : > { %v1684_v36 = vpack.c.bf16 %v1670_v32, %v1670_v32 }
 0x705   : > { %v1786_v41 = vunpack.c.l.b16 %v1684_v36 }
 0x707   : > { %v1788_v45 = vpack.c.b16 %v1786_v41, %v1785_v43 }
 0x70a   : > { %v1673_v33 = vpop.f32.mrf.mxu2 }
 0x70b   : > { %v1685_v34 = vpack.c.bf16 %v1673_v33, %v1673_v33 }
 0x70d   : > { %v1787_v37 = vunpack.c.l.b16 %v1685_v34 }
 0x70f   : > { %v1789_v40 = vpack.c.b16 %v1787_v37, %v1787_v37 }
 0x711   : > { %v1798_v42 = vsel %vm1243_vm14, %v1789_v40, 0 }
 0x712   : > { %v1675_v44 = vpop.f32.mrf.mxu2  ;;  %1806 = vmatpush.bf16.msra.mxu0 %v1798_v42 }
 0x716   : > { %v1723_v46 = vpop.f32.mrf.mxu3  ;;  %1807 = vmatpush.bf16.msra.mxu0 %v1788_v45 }
 0x717   : > { %v1732_v47 = vmul.f32 0.35355338, %v1723_v46 }
 0x719   : > { %v1735_v48 = vadd.f32 %v3568_v39, %v1732_v47  ;;  %v2941_v47 = vld [vmem:[%s3417_s27 + $0x38] sm:$0xff] }
 0x71a   : > { %v1878_v8 = vpop.f32.mrf.mxu2  ;;  %1945 = vmatpush.bf16.msrb.mxu0 %v2941_v47 }
 0x71b   : > { %v1738_v9 = vsel %vm1183_vm15, %v1735_v48, -inf  ;;  %v1957_v49 = vpack.c.bf16 %v1878_v8, %v1878_v8  ;;  %v2940_v8 = vld [vmem:[%s3417_s27 + $0x30] sm:$0xff]  ;;  %s3945_s27 = scalar_lea.vmem %s3872_s10, %s3384_s0 }
 0x71c   : > { %1739 = vmax.xlane.f32.xlu0 %v1738_v9 }
 0x71d   : > { %v3672_v54 = vunpack.c.l.b16 %v1957_v49 }
 0x71e   : > { %v1725_v13 = vpop.f32.mrf.mxu3  ;;  %1946 = vmatpush.bf16.msrb.mxu0 %v2940_v8 }
 0x71f   : > { %v1733_v17 = vmul.f32 0.35355338, %v1725_v13 }
 0x721   : > { %v1736_v50 = vadd.f32 %v3568_v39, %v1733_v17 }
 0x722   : > { %v1880_v51 = vpop.f32.mrf.mxu2 }
 0x723   : > { %v1958_v52 = vpack.c.bf16 %v1880_v51, %v1880_v51  ;;  %v1741_v53 = vsel %vm1183_vm15, %v1736_v50, -inf }
 0x724   : > { %1742 = vmax.xlane.f32.xlu1 %v1741_v53 }
 0x725   : > { %v3674_v55 = vunpack.c.l.b16 %v1958_v52 }
 0x726   : > { %v1728_v56 = vpop.f32.mrf.mxu3 }
 0x727   : > { %v1972_v57 = vpack.c.b16 %v3674_v55, %v3672_v54  ;;  %v1734_v58 = vmul.f32 0.35355338, %v1728_v56  ;;  %v1564_v55 = vadd.f32 %v3613_v11, %v3661_v4 }
 0x729   : > { %v1737_v59 = vadd.f32 %v3568_v39, %v1734_v58 }
 0x72a   : > { %v3679_v60 = vpop.f32.mrf.mxu2 }
 0x72b   : > { %v1744_v61 = vsel %vm1183_vm15, %v1737_v59, -inf }
 0x72c   : > { %1745 = vmax.xlane.f32.xlu2 %v1744_v61 }
 0x72e   : > { %v1730_v0 = vpop.f32.mrf.mxu3 }
 0x732   : > { %v1885_v1 = vpop.f32.mrf.mxu2 }
 0x736   : > { %v1913_v2 = vpop.f32.mrf.mxu3 }
 0x737   : > { %v1960_v20 = vpack.c.bf16 %v1913_v2, %v1913_v2 }
 0x739   : > { %v1977_v25 = vunpack.c.l.b16 %v1960_v20 }
 0x73e   : > { %v1915_v3 = vpop.f32.mrf.mxu3 }
 0x73f   : > { %v1961_v15 = vpack.c.bf16 %v1915_v3, %v1915_v3 }
 0x741   : > { %v1978_v22 = vunpack.c.l.b16 %v1961_v15 }
 0x743   : > { %v1980_v26 = vpack.c.b16 %v1978_v22, %v1977_v25 }
 0x745   : > { %v1989_v27 = vsel %vm1143_vm13, %v1980_v26, 0 }
 0x746   : > { %v1918_v10 = vpop.f32.mrf.mxu3 }
 0x747   : > { %v1962_v14 = vpack.c.bf16 %v1918_v10, %v1918_v10 }
 0x749   : > { %v1979_v16 = vunpack.c.l.b16 %v1962_v14 }
 0x74b   : > { %v1981_v21 = vpack.c.b16 %v1979_v16, %v1979_v16 }
 0x74d   : > { %v1992_v23 = vsel %vm1143_vm13, %v1981_v21, 0 }
 0x74e   : > { %v1920_v24 = vpop.f32.mrf.mxu3  ;;  %2000 = vmatpush.bf16.xpose.msrb.mxu1 %v1992_v23 }
 0x756   : > { %2001 = vmatpush.bf16.xpose.msrb.mxu1 %v1989_v27 }
 0x78f   : > { %v1740_v28 = vpop.xlane.xlu0 %1739 }
 0x790   : > { %v1747_v29 = vsub.f32 %v1735_v48, %v1740_v28 }
 0x792   : > { %v1750_v7 = vmul.f32 1.442695, %v1747_v29 }
 0x794   : > { %3072 = vpow2.f32 %v1750_v7 }
 0x797   : > { %v1743_v31 = vpop.xlane.xlu1 %1742 }
 0x798   : > { %v1748_v32 = vsub.f32 %v1736_v50, %v1743_v31  ;;  %v1566_v31 = vadd.f32 %v3615_v12, %v3663_v5 }
 0x79a   : > { %v3073_v33 = vpop.eup %3072  ;;  %v1752_v34 = vmul.f32 1.442695, %v1748_v32 }
 0x79b   : > { %v1756_v36 = vsel %vm1183_vm15, %v3073_v33, 0.0 }
 0x79c   : > { %3074 = vpow2.f32 %v1752_v34  ;;  %1757 = vadd.xlane.f32.xlu0 %v1756_v36  ;;  %v1569_v34 = vadd.f32 %v3617_v18, %v3665_v6 }
 0x79f   : > { %v1746_v37 = vpop.xlane.xlu2 %1745 }
 0x7a0   : > { %v1749_v38 = vsub.f32 %v1737_v59, %v1746_v37 }
 0x7a2   : > { %v3075_v40 = vpop.eup %3074  ;;  %v1754_v41 = vmul.f32 1.442695, %v1749_v38 }
 0x7a3   : > { %v1759_v42 = vsel %vm1183_vm15, %v3075_v40, 0.0 }
 0x7a4   : > { %3076 = vpow2.f32 %v1754_v41  ;;  %1760 = vadd.xlane.f32.xlu1 %v1759_v42 }
 0x7aa   : > { %v3077_v43 = vpop.eup %3076 }
 0x7ab   : > { %v1762_v44 = vsel %vm1183_vm15, %v3077_v43, 0.0 }
 0x7ac   : > { %1763 = vadd.xlane.f32.xlu2 %v1762_v44 }
 0x80f   : > { %v1758_v45 = vpop.xlane.xlu0 %1757 }
 0x810   : > { %3078 = vrcp.f32 %v1758_v45 }
 0x816   : > { %v3079_v48 = vpop.eup %3078 }
 0x817   : > { %v1761_v46 = vpop.xlane.xlu1 %1760  ;;  %v1768_v9 = vmul.f32 %v3079_v48, %v3073_v33 }
 0x818   : > { %3080 = vrcp.f32 %v1761_v46 }
 0x819   : > { %v1771_v17 = vpack.c.bf16 %v1768_v9, %v1768_v9 }
 0x81b   : > { %v1777_v52 = vunpack.c.l.b16 %v1771_v17 }
 0x81e   : > { %v3081_v13 = vpop.eup %3080 }
 0x81f   : > { %v1769_v49 = vmul.f32 %v3081_v13, %v3075_v40  ;;  %v1764_v50 = vpop.xlane.xlu2 %1763 }
 0x820   : > { %3082 = vrcp.f32 %v1764_v50 }
 0x821   : > { %v1772_v51 = vpack.c.bf16 %v1769_v49, %v1769_v49 }
 0x823   : > { %v1778_v53 = vunpack.c.l.b16 %v1772_v51 }
 0x825   : > { %v1780_v56 = vpack.c.b16 %v1778_v53, %v1777_v52 }
 0x826   : > { %v3083_v58 = vpop.eup %3082 }
 0x827   : > { %2810 = vmatmul.msk.bf16.vlgmr.msra.gmra.mxu0 %vm1183_vm15, %v1780_v56  ;;  %v1770_v59 = vmul.f32 %v3083_v58, %v3077_v43 }
 0x829   : > { %v1773_v61 = vpack.c.bf16 %v1770_v59, %v1770_v59 }
 0x82b   : > { %v1779_v62 = vunpack.c.l.b16 %v1773_v61 }
 0x82d   : > { %v1781_v63 = vpack.c.b16 %v1779_v62, %v1779_v62 }
 0x837   : > { %2811 = vmatmul.msk.bf16.gmra.mxu0 %vm1183_vm15, %v1781_v63  ;;  %v2861_v63 = vld [vmem:[%s3944_s23 + $0xc] sm:$0xf] }
 0x847   : > { %2855 = vmatmul.msk.bf16.vlgmr.msrb.gmra.mxu0 %vm921_vm2, %v3526_v35 }
 0x857   : > { %2856 = vmatmul.msk.bf16.gmra.mxu0 %vm921_vm2, %v3516_v19  ;;  %v1959_v19 = vpack.c.bf16 %v3679_v60, %v3679_v60 }
 0x859   : > { %v1971_v24 = vunpack.c.l.b16 %v1959_v19 }
 0x85b   : > { %v1973_v7 = vpack.c.b16 %v1971_v24, %v1971_v24 }
 0x8a4   : > { %v1809_v0 = vpop.f32.mrf.mxu0 }
 0x8ac   : > { %v1811_v1 = vpop.f32.mrf.mxu0 }
 0x8ad   : > { %v1818_v2 = vpack.c.bf16 %v1811_v1, %v1809_v0  ;;  %v2109_v1 = vsel %vm1243_vm14, %v2861_v63, 0 }
 0x8ae   : > { %2118 = vmatpush.bf16.msra.mxu3 %v2109_v1 }
 0x8af   : > { %2813 = vmatmul.msk.bf16.vlgmr.msra.gmra.mxu1 %vm1143_vm13, %v1818_v2 }
 0x8b4   : > { %v1814_v3 = vpop.f32.mrf.mxu0 }
 0x8b5   : > { %v1819_v14 = vpack.c.bf16 %v1814_v3, %v1814_v3 }
 0x8bc   : > { %v1816_v10 = vpop.f32.mrf.mxu0 }
 0x8bf   : > { %2814 = vmatmul.msk.bf16.gmra.mxu1 %vm1143_vm13, %v1819_v14 }
 0x8c4   : > { %v1948_v15 = vpop.f32.mrf.mxu0 }
 0x8c5   : > { %v1963_v23 = vpack.c.bf16 %v1948_v15, %v1948_v15 }
 0x8c7   : > { %v2065_v28 = vunpack.c.l.b16 %v1963_v23 }
 0x8cc   : > { %v1950_v16 = vpop.f32.mrf.mxu0 }
 0x8cd   : > { %v1964_v21 = vpack.c.bf16 %v1950_v16, %v1950_v16 }
 0x8cf   : > { %2857 = vmatmul.msk.bf16.vlgmr.msrb.gmra.mxu1 %vm1143_vm13, %v1972_v57  ;;  %v2066_v26 = vunpack.c.l.b16 %v1964_v21 }
 0x8d1   : > { %v2068_v54 = vpack.c.b16 %v2066_v26, %v2065_v28 }
 0x8d4   : > { %v1953_v35 = vpop.f32.mrf.mxu0 }
 0x8d5   : > { %v1965_v20 = vpack.c.bf16 %v1953_v35, %v1953_v35 }
 0x8d7   : > { %v2067_v22 = vunpack.c.l.b16 %v1965_v20 }
 0x8d9   : > { %v2069_v25 = vpack.c.b16 %v2067_v22, %v2067_v22 }
 0x8db   : > { %v2078_v27 = vsel %vm1243_vm14, %v2069_v25, 0 }
 0x8dc   : > { %v1955_v29 = vpop.f32.mrf.mxu0  ;;  %2086 = vmatpush.bf16.msra.mxu2 %v2078_v27 }
 0x8df   : > { %2858 = vmatmul.msk.bf16.gmra.mxu1 %vm1143_vm13, %v1973_v7 }
 0x8e0   : > { %2087 = vmatpush.bf16.msra.mxu2 %v2068_v54 }
 0x92c   : > { %v1840_v57 = vpop.f32.mrf.mxu1 }
 0x92d   : > { %v3709_v60 = vadd.f32 %v1840_v57, %v1564_v55 }
 0x934   : > { %v1842_v32 = vpop.f32.mrf.mxu1 }
 0x935   : > { %v3713_v33 = vadd.f32 %v1842_v32, %v1566_v31  ;;  %v3035_v31 = vld [vmem:[%s3945_s27] ss:$0 sm:$0xff] }
 0x936   : > { %v3108_v32 = vld [vmem:[#allocation2] sm:$0xff] }
 0x93c   : > { %v1845_v36 = vpop.f32.mrf.mxu1 }
 0x93d   : > { %v3717_v37 = vadd.f32 %v1845_v36, %v1569_v34 }
 0x944   : > { %v1847_v38 = vpop.f32.mrf.mxu1 }
 0x94c   : > { %v2003_v40 = vpop.f32.mrf.mxu1 }
 0x94d   : > { %v2012_v41 = vmul.f32 0.35355338, %v2003_v40 }
 0x94f   : > { %v2015_v11 = vadd.f32 %v3568_v39, %v2012_v41 }
 0x951   : > { %v2018_v4 = vsel %vm1183_vm15, %v2015_v11, -inf }
 0x952   : > { %2019 = vmax.xlane.f32.xlu0 %v2018_v4 }
 0x954   : > { %v2005_v42 = vpop.f32.mrf.mxu1 }
 0x955   : > { %v2013_v43 = vmul.f32 0.35355338, %v2005_v42 }
 0x957   : > { %v2016_v12 = vadd.f32 %v3568_v39, %v2013_v43 }
 0x959   : > { %v2021_v5 = vsel %vm1183_vm15, %v2016_v12, -inf }
 0x95a   : > { %2022 = vmax.xlane.f32.xlu1 %v2021_v5  ;;  %v3110_v5 = vld [vmem:[#allocation2 + $0x10] sm:$0xff] }
 0x95c   : > { %v2008_v44 = vpop.f32.mrf.mxu1 }
 0x95d   : > { %v2014_v18 = vmul.f32 0.35355338, %v2008_v44 }
 0x95f   : > { %v2017_v6 = vadd.f32 %v3568_v39, %v2014_v18 }
 0x961   : > { %v2024_v45 = vsel %vm1183_vm15, %v2017_v6, -inf }
 0x962   : > { %2025 = vmax.xlane.f32.xlu2 %v2024_v45 }
 0x964   : > { %v2010_v46 = vpop.f32.mrf.mxu1 }
 0x9c5   : > { %v2020_v47 = vpop.xlane.xlu0 %2019 }
 0x9c6   : > { %v2027_v48 = vsub.f32 %v2015_v11, %v2020_v47  ;;  %v3109_v11 = vld [vmem:[#allocation2 + $0x8] sm:$0xff] }
 0x9c8   : > { %v2030_v8 = vmul.f32 1.442695, %v2027_v48 }
 0x9ca   : > { %3084 = vpow2.f32 %v2030_v8 }
 0x9cd   : > { %v2023_v9 = vpop.xlane.xlu1 %2022 }
 0x9ce   : > { %v2028_v13 = vsub.f32 %v2016_v12, %v2023_v9 }
 0x9d0   : > { %v3085_v17 = vpop.eup %3084  ;;  %v2032_v49 = vmul.f32 1.442695, %v2028_v13 }
 0x9d1   : > { %v2036_v50 = vsel %vm1183_vm15, %v3085_v17, 0.0 }
 0x9d2   : > { %3086 = vpow2.f32 %v2032_v49  ;;  %2037 = vadd.xlane.f32.xlu0 %v2036_v50 }
 0x9d5   : > { %v2026_v51 = vpop.xlane.xlu2 %2025 }
 0x9d6   : > { %v2029_v52 = vsub.f32 %v2017_v6, %v2026_v51 }
 0x9d8   : > { %v3087_v39 = vpop.eup %3086  ;;  %v2034_v53 = vmul.f32 1.442695, %v2029_v52 }
 0x9d9   : > { %v2039_v56 = vsel %vm1183_vm15, %v3087_v39, 0.0 }
 0x9da   : > { %3088 = vpow2.f32 %v2034_v53  ;;  %2040 = vadd.xlane.f32.xlu1 %v2039_v56  ;;  %v2943_v56 = vld [vmem:[%s3439_s8 + $0x8] sm:$0xff] }
 0x9db   : > { %2256 = vmatpush.bf16.msra.mxu0 %v2943_v56 }
 0x9e0   : > { %v3089_v58 = vpop.eup %3088 }
 0x9e1   : > { %v2042_v59 = vsel %vm1183_vm15, %v3089_v58, 0.0 }
 0x9e2   : > { %2043 = vadd.xlane.f32.xlu2 %v2042_v59 }
 0xa45   : > { %v2038_v61 = vpop.xlane.xlu0 %2037 }
 0xa46   : > { %3090 = vrcp.f32 %v2038_v61 }
 0xa4c   : > { %v3091_v0 = vpop.eup %3090 }
 0xa4d   : > { %v2041_v62 = vpop.xlane.xlu1 %2040  ;;  %v2048_v2 = vmul.f32 %v3091_v0, %v3085_v17 }
 0xa4e   : > { %3092 = vrcp.f32 %v2041_v62  ;;  %v2942_v62 = vld [vmem:[%s3439_s8] sm:$0xff] }
 0xa4f   : > { %v2051_v10 = vpack.c.bf16 %v2048_v2, %v2048_v2  ;;  %2257 = vmatpush.bf16.msra.mxu0 %v2942_v62 }
 0xa51   : > { %v2057_v35 = vunpack.c.l.b16 %v2051_v10 }
 0xa54   : > { %v3093_v3 = vpop.eup %3092 }
 0xa55   : > { %v2049_v14 = vmul.f32 %v3093_v3, %v3087_v39  ;;  %v2044_v15 = vpop.xlane.xlu2 %2043 }
 0xa56   : > { %3094 = vrcp.f32 %v2044_v15 }
 0xa57   : > { %v2052_v16 = vpack.c.bf16 %v2049_v14, %v2049_v14 }
 0xa59   : > { %v2058_v19 = vunpack.c.l.b16 %v2052_v16 }
 0xa5b   : > { %v2060_v20 = vpack.c.b16 %v2058_v19, %v2057_v35 }
 0xa5c   : > { %v3095_v21 = vpop.eup %3094 }
 0xa5d   : > { %2859 = vmatmul.msk.bf16.vlgmr.msra.gmra.mxu2 %vm1183_vm15, %v2060_v20  ;;  %v2050_v22 = vmul.f32 %v3095_v21, %v3089_v58 }
 0xa5f   : > { %v2053_v23 = vpack.c.bf16 %v2050_v22, %v2050_v22 }
 0xa61   : > { %v2059_v24 = vunpack.c.l.b16 %v2053_v23 }
 0xa63   : > { %v2061_v25 = vpack.c.b16 %v2059_v24, %v2059_v24 }
 0xa6d   : > { %2860 = vmatmul.msk.bf16.gmra.mxu2 %vm1183_vm15, %v2061_v25 }
 0xae0   : > { %v2089_v26 = vpop.f32.mrf.mxu2 }
 0xae8   : > { %v2091_v27 = vpop.f32.mrf.mxu2 }
 0xae9   : > { %v2098_v28 = vpack.c.bf16 %v2091_v27, %v2089_v26 }
 0xaeb   : > { %2862 = vmatmul.msk.bf16.vlgmr.msra.gmra.mxu3 %vm1143_vm13, %v2098_v28  ;;  %v3036_v28 = vld [vmem:[%s3947_s18] ss:$0 sm:$0xff] }
 0xaf0   : > { %v2094_v29 = vpop.f32.mrf.mxu2 }
 0xaf1   : > { %v2099_v54 = vpack.c.bf16 %v2094_v29, %v2094_v29 }
 0xaf8   : > { %v2096_v7 = vpop.f32.mrf.mxu2 }
 0xafb   : > { %2863 = vmatmul.msk.bf16.gmra.mxu3 %vm1143_vm13, %v2099_v54 }
 0xb6e   : > { %v2120_v55 = vpop.f32.mrf.mxu3 }
 0xb6f   : > { %v2129_v57 = vadd.f32 %v2120_v55, %v3709_v60 }
 0xb71   : > { %v2132_v34 = vadd.f32 %v3108_v32, %v2129_v57 }
 0xb73   : > { %v3740_v36 = vadd.f32 %v3035_v31, %v2132_v34 }
 0xb75   : > { %v2144_v38 = vsel %vm921_vm2, %v3740_v36, 0.0 }
 0xb76   : > { %v2122_v40 = vpop.f32.mrf.mxu3  ;;  %2145 = vadd.xlane.f32.xlu0 %v2144_v38 }
 0xb77   : > { %v2130_v41 = vadd.f32 %v2122_v40, %v3713_v33 }
 0xb79   : > { %v2133_v4 = vadd.f32 %v3109_v11, %v2130_v41 }
 0xb7b   : > { %v3745_v42 = vadd.f32 %v3035_v31, %v2133_v4 }
 0xb7d   : > { %v2147_v60 = vsel %vm921_vm2, %v3745_v42, 0.0 }
 0xb7e   : > { %v2125_v43 = vpop.f32.mrf.mxu3  ;;  %2148 = vadd.xlane.f32.xlu1 %v2147_v60 }
 0xb7f   : > { %v2131_v12 = vadd.f32 %v2125_v43, %v3717_v37 }
 0xb81   : > { %v2134_v44 = vadd.f32 %v3110_v5, %v2131_v12 }
 0xb83   : > { %v3750_v18 = vadd.f32 %v3035_v31, %v2134_v44  ;;  %v3037_v31 = vld [vmem:[%s3948_s19] ss:$0 sm:$0xff] }
 0xb85   : > { %v2150_v6 = vsel %vm921_vm2, %v3750_v18, 0.0 }
 0xb86   : > { %v2127_v45 = vpop.f32.mrf.mxu3  ;;  %2151 = vadd.xlane.f32.xlu2 %v2150_v6 }
 0xbe9   : > { %v2146_v33 = vpop.xlane.xlu0 %2145 }
 0xbea   : > { %v2153_v46 = vmul.f32 %v2146_v33, %v3474_v30  ;;  %v2951_v33 = vld [vmem:[%s3448_s15 + $0x38] sm:$0xff] }
 0xbeb   : > { %2365 = vmatpush.bf16.msra.mxu1 %v2951_v33 }
 0xbec   : > { %v2156_v47 = vsub.f32 %v3740_v36, %v2153_v46  ;;  %v2950_v46 = vld [vmem:[%s3448_s15 + $0x30] sm:$0xff] }
 0xbee   : > { %v2159_v48 = vmul.f32 %v2156_v47, %v2156_v47 }
 0xbef   : > { %2366 = vmatpush.bf16.msra.mxu1 %v2950_v46 }
 0xbf0   : > { %v2162_v8 = vsel %vm921_vm2, %v2159_v48, 0.0  ;;  %v2948_v48 = vld [vmem:[%s3448_s15 + $0x20] sm:$0xff] }
 0xbf1   : > { %v2149_v9 = vpop.xlane.xlu1 %2148  ;;  %2163 = vadd.xlane.f32.xlu0 %v2162_v8  ;;  %v2947_v8 = vld [vmem:[%s3448_s15 + $0x18] sm:$0xff] }
 0xbf2   : > { %v2154_v37 = vmul.f32 %v2149_v9, %v3474_v30  ;;  %v2946_v9 = vld [vmem:[%s3448_s15 + $0x10] sm:$0xff] }
 0xbf4   : > { %v2157_v13 = vsub.f32 %v3745_v42, %v2154_v37  ;;  %v2945_v37 = vld [vmem:[%s3448_s15 + $0x8] sm:$0xff] }
 0xbf6   : > { %v2160_v17 = vmul.f32 %v2157_v13, %v2157_v13 }
 0xbf8   : > { %v2165_v49 = vsel %vm921_vm2, %v2160_v17, 0.0  ;;  %v3038_v17 = vld [vmem:[%s841_s9] ss:$0 sm:$0xff] }
 0xbf9   : > { %v2152_v50 = vpop.xlane.xlu2 %2151  ;;  %2166 = vadd.xlane.f32.xlu1 %v2165_v49 }
 0xbfa   : > { %v2155_v51 = vmul.f32 %v2152_v50, %v3474_v30 }
 0xbfc   : > { %v2158_v52 = vsub.f32 %v3750_v18, %v2155_v51 }
 0xbfe   : > { %v2161_v39 = vmul.f32 %v2158_v52, %v2158_v52 }
 0xc00   : > { %v2168_v53 = vsel %vm921_vm2, %v2161_v39, 0.0 }
 0xc01   : > { %2169 = vadd.xlane.f32.xlu2 %v2168_v53 }
 0xc64   : > { %v2164_v58 = vpop.xlane.xlu0 %2163 }
 0xc65   : > { %v2171_v59 = vmul.f32 %v2164_v58, %v3474_v30 }
 0xc67   : > { %v2174_v61 = vadd.f32 1e-05, %v2171_v59 }
 0xc69   : > { %3096 = vrsqrt.f32 %v2174_v61  ;;  %vm2183_vm1 = vweird.f32 %v2174_v61 }
 0xc6c   : > { %v2167_v63 = vpop.xlane.xlu1 %2166 }
 0xc6d   : > { %v2172_v0 = vmul.f32 %v2167_v63, %v3474_v30 }
 0xc6f   : > { %v3097_v1 = vpop.eup %3096  ;;  %v2175_v2 = vadd.f32 1e-05, %v2172_v0 }
 0xc70   : > { %v2178_v3 = vmul.f32 %v3097_v1, %v2174_v61  ;;  %vm2184_vm0 = vweird.f32 %v3097_v1 }
 0xc71   : > { %3098 = vrsqrt.f32 %v2175_v2  ;;  %vm2185_vm3 = vmor %vm2183_vm1, %vm2184_vm0  ;;  %vm2193_vm5 = vweird.f32 %v2175_v2 }
 0xc72   : > { %v2179_v10 = vmul.f32 %v3097_v1, %v2178_v3 }
 0xc74   : > { %v2180_v14 = vmul.f32 0.5, %v2179_v10  ;;  %v2170_v15 = vpop.xlane.xlu2 %2169 }
 0xc75   : > { %v2173_v16 = vmul.f32 %v2170_v15, %v3474_v30 }
 0xc76   : > { %v2181_v35 = vsub.f32 1.5, %v2180_v14 }
 0xc77   : > { %v3099_v19 = vpop.eup %3098  ;;  %v2176_v20 = vadd.f32 1e-05, %v2173_v16 }
 0xc78   : > { %v2182_v21 = vmul.f32 %v3097_v1, %v2181_v35  ;;  %v2188_v22 = vmul.f32 %v3099_v19, %v2175_v2  ;;  %vm2194_vm4 = vweird.f32 %v3099_v19 }
 0xc79   : > { %3100 = vrsqrt.f32 %v2176_v20  ;;  %vm2195_vm6 = vmor %vm2193_vm5, %vm2194_vm4  ;;  %vm2203_vm8 = vweird.f32 %v2176_v20 }
 0xc7a   : > { %v2189_v23 = vmul.f32 %v3099_v19, %v2188_v22  ;;  %v2186_v24 = vsel %vm2185_vm3, %v3097_v1, %v2182_v21 }
 0xc7b   : > { %v2207_v29 = vmul.f32 %v2186_v24, %v2156_v47  ;;  %v2949_v47 = vld [vmem:[%s3448_s15 + $0x28] sm:$0xff] }
 0xc7c   : > { %v2190_v25 = vmul.f32 0.5, %v2189_v23  ;;  %2367 = vmatpush.bf16.msra.mxu1 %v2949_v47 }
 0xc7d   : > { %v2213_v32 = vmul.f32 %v3036_v28, %v2207_v29 }
 0xc7e   : > { %v2191_v26 = vsub.f32 1.5, %v2190_v25 }
 0xc7f   : > { %v3101_v27 = vpop.eup %3100  ;;  %v2219_v11 = vadd.f32 %v3037_v31, %v2213_v32 }
 0xc80   : > { %v2192_v7 = vmul.f32 %v3099_v19, %v2191_v26  ;;  %v2198_v54 = vmul.f32 %v3101_v27, %v2176_v20  ;;  %vm2204_vm7 = vweird.f32 %v3101_v27  ;;  %2368 = vmatpush.bf16.msra.mxu1 %v2948_v48 }
 0xc81   : > { %vm2205_vm9 = vmor %vm2203_vm8, %vm2204_vm7 }
 0xc82   : > { %v2196_v55 = vsel %vm2195_vm6, %v3099_v19, %v2192_v7  ;;  %v2199_v57 = vmul.f32 %v3101_v27, %v2198_v54 }
 0xc83   : > { %v2208_v34 = vmul.f32 %v2196_v55, %v2157_v13  ;;  %v2944_v13 = vld [vmem:[%s3448_s15] sm:$0xff] }
 0xc84   : > { %v2200_v38 = vmul.f32 0.5, %v2199_v57  ;;  %2369 = vmatpush.bf16.msra.mxu1 %v2947_v8 }
 0xc85   : > { %v2214_v40 = vmul.f32 %v3036_v28, %v2208_v34 }
 0xc86   : > { %v2201_v41 = vsub.f32 1.5, %v2200_v38 }
 0xc87   : > { %v2220_v4 = vadd.f32 %v3037_v31, %v2214_v40 }
 0xc88   : > { %v2202_v60 = vmul.f32 %v3101_v27, %v2201_v41  ;;  %2370 = vmatpush.bf16.msra.mxu1 %v2946_v9 }
 0xc89   : > { %v2222_v43 = vpack.c.bf16 %v2220_v4, %v2219_v11 }
 0xc8a   : > { %v2206_v12 = vsel %vm2205_vm9, %v3101_v27, %v2202_v60 }
 0xc8b   : > { %2872 = vmatmul.msk.bf16.vlgmr.msra.gmra.mxu0 %vm921_vm2, %v2222_v43  ;;  %v2209_v5 = vmul.f32 %v2206_v12, %v2158_v52 }
 0xc8c   : > { %2371 = vmatpush.bf16.msra.mxu1 %v2945_v37 }
 0xc8d   : > { %v2215_v44 = vmul.f32 %v3036_v28, %v2209_v5 }
 0xc8f   : > { %v2221_v6 = vadd.f32 %v3037_v31, %v2215_v44  ;;  %v3039_v31 = vld [vmem:[%s849_s11] ss:$0 sm:$0xff]  ;;  %s3950_s11 = sld [smem:[#allocation8_spill]] }
 0xc90   : > { %2372 = vmatpush.bf16.msra.mxu1 %v2944_v13 }
 0xc91   : > { %v2223_v45 = vpack.c.bf16 %v2221_v6, %v2221_v6 }
 0xc95   : > { %p2906_p1 = scmp.ne.s32.totalorder %s3950_s11, 1 }
 0xc96   : > { %s3951_s6 = sld [smem:[#allocation31_spill]] (!%p2906_p1) }
 0xc97   : > { %s3952_s16 = sld [smem:[#allocation32_spill]] (!%p2906_p1) }
 0xc9b   : > { %2873 = vmatmul.msk.bf16.gmra.mxu0 %vm921_vm2, %v2223_v45 }
 0xd08   : > { %v2259_v49 = vpop.f32.mrf.mxu0 }
 0xd09   : > { %v2260_v50 = vadd.f32 %v3038_v17, %v2259_v49 }
 0xd0b   : > { %v2271_v51 = vmul.f32 %v2260_v50, %v2260_v50  ;;  %v2268_v23 = vmul.f32 0.5, %v2260_v50 }
 0xd0d   : > { %v2274_v52 = vmul.f32 %v2271_v51, %v2260_v50 }
 0xd0f   : > { %v2277_v39 = vmul.f32 0.044715, %v2274_v52 }
 0xd10   : > { %v2261_v53 = vpop.f32.mrf.mxu0 }
 0xd11   : > { %v2280_v56 = vadd.f32 %v2277_v39, %v2260_v50  ;;  %v2262_v58 = vadd.f32 %v3038_v17, %v2261_v53 }
 0xd13   : > { %v2272_v59 = vmul.f32 %v2262_v58, %v2262_v58  ;;  %v2283_v61 = vmul.f32 0.7978846, %v2280_v56  ;;  %v2269_v24 = vmul.f32 0.5, %v2262_v58 }
 0xd15   : > { %v2275_v62 = vmul.f32 %v2272_v59, %v2262_v58  ;;  %3102 = vtanh.f32 %v2283_v61 }
 0xd17   : > { %v2278_v63 = vmul.f32 0.044715, %v2275_v62 }
 0xd18   : > { %v2264_v0 = vpop.f32.mrf.mxu0 }
 0xd19   : > { %v2281_v1 = vadd.f32 %v2278_v63, %v2262_v58  ;;  %v2265_v2 = vadd.f32 %v3038_v17, %v2264_v0 }
 0xd1b   : > { %v2284_v3 = vmul.f32 0.7978846, %v2281_v1  ;;  %v2273_v10 = vmul.f32 %v2265_v2, %v2265_v2  ;;  %v3103_v15 = vpop.eup %3102  ;;  %v2270_v54 = vmul.f32 0.5, %v2265_v2 }
 0xd1c   : > { %v2289_v20 = vadd.f32 1.0, %v3103_v15 }
 0xd1d   : > { %3104 = vtanh.f32 %v2284_v3  ;;  %v2276_v14 = vmul.f32 %v2273_v10, %v2265_v2 }
 0xd1e   : > { %v2292_v26 = vmul.f32 %v2289_v20, %v2268_v23 }
 0xd1f   : > { %v2279_v16 = vmul.f32 0.044715, %v2276_v14 }
 0xd20   : > { %v2266_v35 = vpop.f32.mrf.mxu0 }
 0xd21   : > { %v2282_v19 = vadd.f32 %v2279_v16, %v2265_v2 }
 0xd23   : > { %v3105_v21 = vpop.eup %3104  ;;  %v2285_v22 = vmul.f32 0.7978846, %v2282_v19 }
 0xd24   : > { %v2290_v25 = vadd.f32 1.0, %v3105_v21 }
 0xd25   : > { %3106 = vtanh.f32 %v2285_v22 }
 0xd26   : > { %v2293_v27 = vmul.f32 %v2290_v25, %v2269_v24 }
 0xd28   : > { %v2295_v28 = vpack.c.bf16 %v2293_v27, %v2292_v26 }
 0xd2a   : > { %2373 = vmatmul.bf16.vlgmr.msra.gmra.mxu1 %v2295_v28 }
 0xd2b   : > { %v3107_v29 = vpop.eup %3106 }
 0xd2c   : > { %v2291_v7 = vadd.f32 1.0, %v3107_v29 }
 0xd2e   : > { %v2294_v55 = vmul.f32 %v2291_v7, %v2270_v54 }
 0xd30   : > { %v2296_v57 = vpack.c.bf16 %v2294_v55, %v2294_v55 }
 0xd3a   : > { %2378 = vmatmul.bf16.gmra.mxu1 %v2296_v57 }
 0xda7   : > { %v2374_v32 = vpop.f32.mrf.mxu1 }
 0xda8   : > { %v2375_v34 = vadd.f32 %v3039_v31, %v2374_v32 }
 0xdaa   : > { %v2383_v38 = vadd.f32 %v2375_v34, %v3740_v36 }
 0xdac   : > { %2386 = vst.msk [vmem:[#allocation2] sm:$0xff] %vm921_vm2, %v2383_v38 }
 0xdaf   : > { %v2376_v40 = vpop.f32.mrf.mxu1 }
 0xdb0   : > { %v2377_v41 = vadd.f32 %v3039_v31, %v2376_v40 }
 0xdb2   : > { %v2384_v11 = vadd.f32 %v2377_v41, %v3745_v42 }
 0xdb4   : > { %2387 = vst.msk [vmem:[#allocation2 + $0x8] sm:$0xff] %vm921_vm2, %v2384_v11 }
 0xdb7   : > { %v2379_v4 = vpop.f32.mrf.mxu1 }
 0xdb8   : > { %v2380_v60 = vadd.f32 %v3039_v31, %v2379_v4 }
 0xdba   : > { %v2385_v43 = vadd.f32 %v2380_v60, %v3750_v18 }
 0xdbb   : > { %2392 = sbr.rel (%p2906_p1) target bundleno = 3790 (0xece), region = 104 }
 0xdbc   : > { %2388 = vst.msk [vmem:[#allocation2 + $0x10] sm:$0xff] %vm921_vm2, %v2385_v43 }
 0xdbf   : > { %v2381_v12 = vpop.f32.mrf.mxu1 }
 0xdc0   : > { %vm2395_vm10 = vcmask 253952   ;;  %v2393_v17 = vld [vmem:[%s3951_s6] sm:$0x1] }
 0xdc1   : > { %v2396_v36 = vsel %vm2395_vm10, %v2383_v38, 0.0 }
 0xdc2   : > { %2397 = vadd.xlane.f32.xlu0 %v2396_v36 }
 0xe35   : > { %v2398_v5 = vpop.xlane.xlu0 %2397 }
 0xe36   : > { %v2399_v44 = vmul.f32 %v2398_v5, %v3474_v30 }
 0xe38   : > { %v2400_v42 = vsub.f32 %v2383_v38, %v2399_v44 }
 0xe3a   : > { %v2401_v6 = vmul.f32 %v2400_v42, %v2400_v42 }
 0xe3c   : > { %v2402_v45 = vsel %vm2395_vm10, %v2401_v6, 0.0 }
 0xe3d   : > { %2403 = vadd.xlane.f32.xlu0 %v2402_v45 }
 0xeb0   : > { %v2404_v33 = vpop.xlane.xlu0 %2403 }
 0xeb1   : > { %v2405_v18 = vmul.f32 %v2404_v33, %v3474_v30  ;;  %v2394_v30 = vld [vmem:[%s3952_s16] sm:$0x1] }
 0xeb3   : > { %v2406_v46 = vadd.f32 1e-05, %v2405_v18 }
 0xeb5   : > { %3111 = vrsqrt.f32 %v2406_v46  ;;  %vm2413_vm11 = vweird.f32 %v2406_v46 }
 0xebb   : > { %v3112_v47 = vpop.eup %3111 }
 0xebc   : > { %v2408_v48 = vmul.f32 %v3112_v47, %v2406_v46  ;;  %vm2414_vm2 = vweird.f32 %v3112_v47 }
 0xebd   : > { %vm2415_vm12 = vmor %vm2413_vm11, %vm2414_vm2 }
 0xebe   : > { %v2409_v8 = vmul.f32 %v3112_v47, %v2408_v48 }
 0xec0   : > { %v2410_v9 = vmul.f32 0.5, %v2409_v8 }
 0xec2   : > { %v2411_v37 = vsub.f32 1.5, %v2410_v9 }
 0xec4   : > { %v2412_v13 = vmul.f32 %v3112_v47, %v2411_v37 }
 0xec6   : > { %v2416_v49 = vsel %vm2415_vm12, %v3112_v47, %v2412_v13 }
 0xec7   : > { %v2417_v50 = vmul.f32 %v2416_v49, %v2400_v42 }
 0xec9   : > { %v2418_v51 = vmul.f32 %v2417_v50, %v2393_v17 }
 0xecb   : > { %v2419_v52 = vadd.f32 %v2418_v51, %v2394_v30 }
 0xecd   : > { %2420 = vst.msk [vmem:[%s3456_s25] sm:$0x1] %vm2395_vm10, %v2419_v52 }
 0xece PF: > { %s3953_s23 = sld [smem:[#allocation9_spill]]  ;;  %s2432_s22 = sshll.u32 %s3456_s25, 4  ;;  %s2433_s22 = int_to_ptr.vmem [resolvable:$true] %s2432_s22 }
 0xecf   : > { %s3954_s27 = sld [smem:[#allocation33_spill]]  ;;  %s3956_s3 = sand.u32 1, %s3183_s30  }
 0xed0   : > { %s2422_s5 = scalar_lea.sflag [#allocation4], %s3956_s3 }
 0xed5   : > { %s2430_s1 = scalar_lea.hbm %s3954_s27, %s3953_s23  ;;  %s3133_s15 = scalar_lea.hbm %s3954_s27, 2 }
 0xed6   : > { %s2434_s18 = sshll.u32 %s2430_s1, 4  ;;  %s2435_s18 = int_to_ptr.hbm [resolvable:$true] %s2434_s18 }
 0xed7   : > { %s3127_s19 = sshra.s32 %s2435_s18, 4  ;;  %s3128_s19 = int_to_ptr.hbm [resolvable:$true] %s3127_s19 }
 0xed8   : > { %s3129_s21 = scalar_lea.hbm %s3128_s19, 1  ;;  %p3134_p6 = scmp.lt.s32.totalorder %s3128_s19, %s3954_s27 }
 0xed9   : > { %p3130_p2 = scmp.ne.s32.totalorder %s3128_s19, %s3129_s21  ;;  %p3135_p7 = scmp.lt.s32.totalorder %s3133_s15, %s3129_s21 }
 0xedb   : > { %p3131_p4 = pnand %p3130_p2, %p3359_p3  ;;  %p3136_p8 = por %p3135_p7, %p3134_p6 }
 0xedd   : > { %p3132_p5 = pneg %p3131_p4 }
 0xedf   : > { %p3137_p10 = pnand %p3136_p8, %p3132_p5 }
 0xee1   : > { %3140 = shalt.err (!%p3137_p10)
}
 0xee2   : > { %2960 = dma.vmem_to_hbm [thread:$0]  (%p3359_p3), %s2433_s22, 16, %s2435_s18, %s2422_s5  }
 0xee3 PF: > { %s3957_s25 = sld [smem:[#allocation12_spill]] }
 0xee4   : > { %s3958_s0 = sld [smem:[#allocation6_spill]] }
 0xee9   : > { %p2966_p11 = scmp.ge.s32.totalorder %s3957_s25, 2 }
 0xeea   : > { %s2446_s6 = sand.u32 1, %s3958_s0  }
 0xeeb   : > { %p2963_p12 = pnand %p2966_p11, %p3369_p9  ;;  %s2447_s26 = scalar_lea.sflag [#allocation4], %s2446_s6 }
 0xeed   : > { %p2964_p13 = pneg %p2963_p12 }
 0xeef   : > { %3174 = dma.done.wait (%p2964_p13), %s2447_s26, 16  }
 0xef0   : > { %3176 = vsyncadd (%p2964_p13), %s2447_s26, 4294967280  ;;  %s32_s23 = sadd.s32 1, %s3957_s25   ;;  %s3960_s7 = sld [smem:[#allocation7_spill]] }
 0xef1   : > { %p29_p0 = scmp.ge.s32.totalorder %s32_s23, 6   ;;  %s3961_s20 = sld [smem:[#allocation17_spill]] }
 0xef2   : > { %s3962_s21 = sld [smem:[#allocation10_spill]]  ;;  %s3966_s0 = smov %s3183_s30 }
 0xef3   : > { %s3963_s1 = sld [smem:[#allocation11_spill]]  ;;  %31 = sbr.rel (!%p29_p0) target bundleno = 21 (0x15), region = 193 }
 0xef4   : > { %s3964_s22 = sld [smem:[#allocation13_spill]] }
 0xef5   : > { %s3965_s2 = sld [smem:[#allocation15_spill]] }
 0xef6   : > { %s3967_s30 = smov %s3960_s7 }
 0xef8   :  { %2452 = vsyncpa [#allocation4], 1 }
 0xef9   :  { %2454 = vsyncpa [#allocation4 + $0x1], 1 }

</bundles_post_ra>
